<compile_context>
chip_gen: v7x
topology: tpu7x:2x2x1
jax: 0.10.0
libtpu: 0.0.40
codegen_flags: <defaults>
</compile_context>

<pallas_src>
import math
import functools

import jax
import jax.numpy as jnp
from jax.experimental import pallas as pl
from jax.experimental.pallas import tpu as pltpu

# ----------------------- synthetic model config -----------------------------
VOCAB = 64
HIDDEN = 128
N_LAYERS = 2
N_HEADS = 2
N_KV_HEADS = 1                         # multi-query attention (ChatGLM2 style)
HEAD_DIM = HIDDEN // N_HEADS           # 64
QDIM = N_HEADS * HEAD_DIM              # 128
KVDIM = N_KV_HEADS * HEAD_DIM          # 64
QKV_OUT = QDIM + 2 * KVDIM             # 256
FFN = 128                              # SwiGLU inner dim
ROT_DIM = HEAD_DIM // 2                # rotary applied to first half of head_dim
EPS = 1e-5
B, S = 2, 8
T = B * S


# --------------------------- fused Pallas kernel -----------------------------


def _glm_model_kernel(x_ref, bias_ref, cos_ref, sin_ref,
                      ln1_ref, wqkv_ref, bqkv_ref, wqkvs_ref, bqkvs_ref,
                      wo_ref, ln2_ref, w14_ref, w41_ref, fln_ref, o_ref):
    """Whole ChatGLM2-style transformer in one kernel (single grid step)."""
    scale = 1.0 / math.sqrt(HEAD_DIM)

    def rms(x, w):                       # fp32 RMSNorm
        var = jnp.mean(x * x, axis=-1, keepdims=True)
        return x * jax.lax.rsqrt(var + EPS) * w

    def mm(a, b):                        # bf16 MXU inputs, fp32 accumulate
        return jnp.dot(a.astype(jnp.bfloat16), b,
                       preferred_element_type=jnp.float32)

    x = x_ref[...].astype(jnp.float32)   # (T, H)
    cos = cos_ref[...]                   # (T, QKV_OUT)
    sin = sin_ref[...]                   # (T, QKV_OUT), sign + zeros baked in
    o_ref[0] = x                         # hidden_states[0] = embeddings

    for l in range(N_LAYERS):            # static unroll, tiny layer count
        # ------------------------- self attention --------------------------
        h = rms(x, ln1_ref[l])
        qkv = mm(h, wqkv_ref[l]) + bqkv_ref[l]          # (T, QKV_OUT)
        qkv_sw = mm(h, wqkvs_ref[l]) + bqkvs_ref[l]     # pair-swapped columns
        qkv = qkv * cos + qkv_sw * sin                  # ChatGLM2 RoPE

        q = qkv[:, :QDIM]                               # (T, 128)
        k = qkv[:, QDIM:QDIM + KVDIM]                   # (T, 64)
        v = qkv[:, QDIM + KVDIM:]                       # (T, 64)

        attn_rows = []
        for b in range(B):                              # static, B = 2
            r0 = b * S
            kb = k[r0:r0 + S, :].astype(jnp.bfloat16)   # (S, D)
            vb = v[r0:r0 + S, :].astype(jnp.bfloat16)   # (S, D)
            # fold heads onto rows: (NH*S, D), rows ordered (head, seq)
            qb = jnp.concatenate(
                [q[r0:r0 + S, hh * HEAD_DIM:(hh + 1) * HEAD_DIM]
                 for hh in range(N_HEADS)], axis=0)
            s = jax.lax.dot_general(
                qb.astype(jnp.bfloat16), kb, (((1,), (1,)), ((), ())),
                preferred_element_type=jnp.float32) * scale
            s = s + bias_ref[b]                         # (NH*S, S) additive mask
            m = jnp.max(s, axis=-1, keepdims=True)
            p = jnp.exp(s - m)
            denom = jnp.sum(p, axis=-1, keepdims=True)
            p = p * pl.reciprocal(denom, approx=True)   # EUP reciprocal
            ob = jnp.dot(p.astype(jnp.bfloat16), vb,
                         preferred_element_type=jnp.float32)   # (NH*S, D)
            attn_rows.append(jnp.concatenate(
                [ob[hh * S:(hh + 1) * S, :] for hh in range(N_HEADS)], axis=1))
        attn = jnp.concatenate(attn_rows, axis=0)       # (T, QDIM)

        x = x + mm(attn, wo_ref[l])                     # residual

        # --------------------------- SwiGLU MLP -----------------------------
        h2 = rms(x, ln2_ref[l])
        h4 = mm(h2, w14_ref[l])                         # (T, 2*FFN)
        a = h4[:, :FFN]
        g = h4[:, FFN:]
        act = a * jax.nn.sigmoid(a) * g                 # fp32 elementwise
        x = x + mm(act, w41_ref[l])                     # residual

        if l < N_LAYERS - 1:
            o_ref[l + 1] = x                            # intermediate hidden

    x = rms(x, fln_ref[...])                            # final RMSNorm
    o_ref[N_LAYERS] = x


def _full_spec(shape):
    nd = len(shape)
    return pl.BlockSpec(tuple(shape), lambda i, _nd=nd: (0,) * _nd)


def glm_forward_fused(packed, x, bias_t, cos_all, sin_all):
    """Single pallas_call over the whole model. Returns (N_LAYERS+1, T, H) f32."""
    args = (x, bias_t, cos_all, sin_all,
            packed["ln1"], packed["wqkv"], packed["bqkv"],
            packed["wqkv_sw"], packed["bqkv_sw"], packed["wo"],
            packed["ln2"], packed["w14"], packed["w41"], packed["fln"])
    out_shape = jax.ShapeDtypeStruct((N_LAYERS + 1, x.shape[0], HIDDEN),
                                     jnp.float32)
    return pl.pallas_call(
        _glm_model_kernel,
        out_shape=out_shape,
        grid=(1,),
        in_specs=[_full_spec(a.shape) for a in args],
        out_specs=_full_spec(out_shape.shape),
        compiler_params=pltpu.CompilerParams(
            dimension_semantics=("arbitrary",)),
    )(*args)


# ------------------------------- JAX glue ------------------------------------


def build_rope_tables(position_ids):
    """Full-width cos/sin tables so RoPE is a fused multiply-add in the kernel.

    ChatGLM2 RoPE: interleaved even/odd pairs on the first half of head_dim,
    identity on the second half; identity on V.  Sign of sin and the zero /
    one pass-through pattern are baked in here.
    """
    Bc, Sc = position_ids.shape
    Tc = Bc * Sc
    nfreq = ROT_DIM // 2
    theta = 1.0 / (10000.0 ** (jnp.arange(nfreq, dtype=jnp.float32) * 2.0 / ROT_DIM))
    ang = position_ids.reshape(Tc, 1).astype(jnp.float32) * theta[None, :]  # (T, nfreq)
    cos = jnp.cos(ang)
    sin = jnp.sin(ang)
    cos_head = jnp.concatenate(
        [jnp.repeat(cos, 2, axis=1),                       # c0,c0,c1,c1,...
         jnp.ones((Tc, HEAD_DIM - ROT_DIM), jnp.float32)], axis=1)
    sin_head = jnp.concatenate(
        [jnp.stack([-sin, sin], axis=-1).reshape(Tc, ROT_DIM),  # -s0,+s0,...
         jnp.zeros((Tc, HEAD_DIM - ROT_DIM), jnp.float32)], axis=1)
    cos_all = jnp.concatenate(
        [jnp.tile(cos_head, (1, N_HEADS + N_KV_HEADS)),    # q + k get RoPE
         jnp.ones((Tc, KVDIM), jnp.float32)], axis=1)      # v: identity
    sin_all = jnp.concatenate(
        [jnp.tile(sin_head, (1, N_HEADS + N_KV_HEADS)),
         jnp.zeros((Tc, KVDIM), jnp.float32)], axis=1)
    return cos_all, sin_all


def pack_params(params):
    """Stack per-layer weights, cast matmul weights to bf16, and build the
    column-pair-swapped QKV weight used to express RoPE's pair swap as a
    second matmul (static weight transform)."""
    L = len(params["layers"])

    def stack(key):
        return jnp.stack([layer[key] for layer in params["layers"]])

    perm = jnp.arange(QKV_OUT) ^ 1                       # swap adjacent columns
    wqkv = stack("wqkv").astype(jnp.bfloat16)            # (L, H, QKV_OUT)
    bqkv = stack("bqkv").reshape(L, 1, QKV_OUT)          # f32
    return dict(
        ln1=stack("ln1_w").reshape(L, 1, HIDDEN),
        wqkv=wqkv,
        bqkv=bqkv,
        wqkv_sw=wqkv[:, :, perm],
        bqkv_sw=bqkv[:, :, perm],
        wo=stack("wo").astype(jnp.bfloat16),
        ln2=stack("ln2_w").reshape(L, 1, HIDDEN),
        w14=stack("w_h_to_4h").astype(jnp.bfloat16),
        w41=stack("w_4h_to_h").astype(jnp.bfloat16),
        fln=params["final_ln_w"].reshape(1, HIDDEN),
    )


def chatglm_encode(params, input_ids, attention_mask, position_ids,
                   use_layer=-1, normalize=False, full_attention_mask=False,
                   return_mask_when_encode_text=False):
    """Mirrors ChatGLMEncoder.encode()."""
    if full_attention_mask:
        attention_mask = attention_mask[:, None, None, :]
        key_mask = attention_mask[:, 0, 0, :]
    else:
        key_mask = attention_mask

    Bc, Sc = input_ids.shape
    x = params["wte"][input_ids].reshape(Bc * Sc, HIDDEN)          # (T, H)

    # additive attention bias: causal + key padding (0 keep / -1e9 drop),
    # pre-tiled over heads to match the (head, seq)-folded score rows.
    # NOTE: fully-masked rows (none occur here) would softmax to uniform, not NaN.
    causal = jnp.tril(jnp.ones((Sc, Sc), jnp.float32))
    allowed = causal[None, :, :] * key_mask.astype(jnp.float32)[:, None, :]
    bias = jnp.where(allowed > 0, 0.0, -1e9).astype(jnp.float32)   # (B, S, S)
    bias_t = jnp.tile(bias, (1, N_HEADS, 1))                       # (B, NH*S, S)

    cos_all, sin_all = build_rope_tables(position_ids)
    packed = pack_params(params)

    hs = glm_forward_fused(packed, x, bias_t, cos_all, sin_all)    # (L+1, T, H)

    context = hs[use_layer].reshape(Bc, Sc, HIDDEN)                # fp32 already
    if normalize:
        # F.normalize-style eps clamp (avoids NaN on all-zero rows)
        n = jnp.sqrt(jnp.sum(context * context, axis=-1, keepdims=True))
        context = context / jnp.maximum(n, 1e-12)
    if return_mask_when_encode_text:
        return context, attention_mask
    return context, None


# ---------------------------- deterministic init -----------------------------


def init_params(key):
    keys = iter(jax.random.split(key, 8 * N_LAYERS + 4))

    def nrm(shape, scale=0.02):
        return scale * jax.random.normal(next(keys), shape, jnp.float32)

    layers = []
    for _ in range(N_LAYERS):
        layers.append({
            "ln1_w": jnp.ones((HIDDEN,), jnp.float32),
            "wqkv": nrm((HIDDEN, QKV_OUT)),
            "bqkv": nrm((QKV_OUT,)),                   # add_qkv_bias=True
            "wo": nrm((QDIM, HIDDEN)),                 # no bias (ChatGLM2 dense)
            "ln2_w": jnp.ones((HIDDEN,), jnp.float32),
            "w_h_to_4h": nrm((HIDDEN, 2 * FFN)),
            "w_4h_to_h": nrm((FFN, HIDDEN)),
        })
    return {
        "wte": nrm((VOCAB, HIDDEN)),
        "layers": layers,
        "final_ln_w": jnp.ones((HIDDEN,), jnp.float32),
    }


# TODO(synk): tokenizer / pretrained-checkpoint loading / quantize(quant_bit)
# have no Pallas equivalent; this script uses synthetic deterministic weights.

if __name__ == "__main__":
    key = jax.random.PRNGKey(0)
    pkey, ikey = jax.random.split(key)
    params = init_params(pkey)

    input_ids = jax.random.randint(ikey, (B, S), 0, VOCAB, dtype=jnp.int32)
    attention_mask = jnp.array([[1] * S, [1] * (S - 2) + [0, 0]], dtype=jnp.int32)
    position_ids = jnp.broadcast_to(jnp.arange(S, dtype=jnp.int32), (B, S))

    encode = jax.jit(
        chatglm_encode,
        static_argnames=("use_layer", "normalize", "full_attention_mask",
                         "return_mask_when_encode_text"))
    context, mask_out = encode(params, input_ids, attention_mask, position_ids)
    jax.block_until_ready(context)

    assert context.shape == (B, S, HIDDEN)
    assert context.dtype == jnp.float32
    assert bool(jnp.all(jnp.isfinite(context)))
    assert mask_out is None
    print("KERNEL_OK")
</pallas_src>

<mosaic_0001>
module attributes {stable_mosaic.version = 11 : i64} {
  func.func @_glm_model_kernel(%arg0: i32, %arg1: memref<16x128xf32, #tpu.memory_space<vmem>>, %arg2: memref<2x16x8xf32, #tpu.memory_space<vmem>>, %arg3: memref<16x256xf32, #tpu.memory_space<vmem>>, %arg4: memref<16x256xf32, #tpu.memory_space<vmem>>, %arg5: memref<2x1x128xf32, #tpu.memory_space<vmem>>, %arg6: memref<2x128x256xbf16, #tpu.memory_space<vmem>>, %arg7: memref<2x1x256xf32, #tpu.memory_space<vmem>>, %arg8: memref<2x128x256xbf16, #tpu.memory_space<vmem>>, %arg9: memref<2x1x256xf32, #tpu.memory_space<vmem>>, %arg10: memref<2x128x128xbf16, #tpu.memory_space<vmem>>, %arg11: memref<2x1x128xf32, #tpu.memory_space<vmem>>, %arg12: memref<2x128x256xbf16, #tpu.memory_space<vmem>>, %arg13: memref<2x128x128xbf16, #tpu.memory_space<vmem>>, %arg14: memref<1x128xf32, #tpu.memory_space<vmem>>, %arg15: memref<3x16x128xf32, #tpu.memory_space<vmem>>) attributes {dimension_semantics = [#tpu.dimension_semantics<arbitrary>], iteration_bounds = array<i64: 1>, scalar_prefetch = 0 : i64, scratch_operands = 0 : i64, tpu.core_type = #tpu.core_type<tc>, window_params = [{pipeline_mode = #tpu.pipeline_mode<synchronous>, transform_indices = @transform_0, window_bounds = array<i64: 16, 128>}, {pipeline_mode = #tpu.pipeline_mode<synchronous>, transform_indices = @transform_1, window_bounds = array<i64: 2, 16, 8>}, {pipeline_mode = #tpu.pipeline_mode<synchronous>, transform_indices = @transform_2, window_bounds = array<i64: 16, 256>}, {pipeline_mode = #tpu.pipeline_mode<synchronous>, transform_indices = @transform_3, window_bounds = array<i64: 16, 256>}, {pipeline_mode = #tpu.pipeline_mode<synchronous>, transform_indices = @transform_4, window_bounds = array<i64: 2, 1, 128>}, {pipeline_mode = #tpu.pipeline_mode<synchronous>, transform_indices = @transform_5, window_bounds = array<i64: 2, 128, 256>}, {pipeline_mode = #tpu.pipeline_mode<synchronous>, transform_indices = @transform_6, window_bounds = array<i64: 2, 1, 256>}, {pipeline_mode = #tpu.pipeline_mode<synchronous>, transform_indices = @transform_7, window_bounds = array<i64: 2, 128, 256>}, {pipeline_mode = #tpu.pipeline_mode<synchronous>, transform_indices = @transform_8, window_bounds = array<i64: 2, 1, 256>}, {pipeline_mode = #tpu.pipeline_mode<synchronous>, transform_indices = @transform_9, window_bounds = array<i64: 2, 128, 128>}, {pipeline_mode = #tpu.pipeline_mode<synchronous>, transform_indices = @transform_10, window_bounds = array<i64: 2, 1, 128>}, {pipeline_mode = #tpu.pipeline_mode<synchronous>, transform_indices = @transform_11, window_bounds = array<i64: 2, 128, 256>}, {pipeline_mode = #tpu.pipeline_mode<synchronous>, transform_indices = @transform_12, window_bounds = array<i64: 2, 128, 128>}, {pipeline_mode = #tpu.pipeline_mode<synchronous>, transform_indices = @transform_13, window_bounds = array<i64: 1, 128>}, {pipeline_mode = #tpu.pipeline_mode<synchronous>, transform_indices = @transform_14, window_bounds = array<i64: 3, 16, 128>}]} {
    %c0 = arith.constant 0 : index
    %c0_0 = arith.constant 0 : index
    %0 = vector.load %arg1[%c0, %c0_0] : memref<16x128xf32, #tpu.memory_space<vmem>>, vector<16x128xf32>
    %c0_1 = arith.constant 0 : index
    %c0_2 = arith.constant 0 : index
    %1 = vector.load %arg3[%c0_1, %c0_2] : memref<16x256xf32, #tpu.memory_space<vmem>>, vector<16x256xf32>
    %c0_3 = arith.constant 0 : index
    %c0_4 = arith.constant 0 : index
    %2 = vector.load %arg4[%c0_3, %c0_4] : memref<16x256xf32, #tpu.memory_space<vmem>>, vector<16x256xf32>
    %c0_5 = arith.constant 0 : index
    %c0_6 = arith.constant 0 : index
    %c0_7 = arith.constant 0 : index
    %3 = vector.load %arg15[%c0_5, %c0_6, %c0_7] : memref<3x16x128xf32, #tpu.memory_space<vmem>>, vector<1x16x128xf32>
    %4 = vector.shape_cast %3 : vector<1x16x128xf32> to vector<16x128xf32>
    %5 = vector.shape_cast %0 : vector<16x128xf32> to vector<1x16x128xf32>
    tpu.vector_store %arg15[%c0_5, %c0_6, %c0_7], %5 {strides = array<i32>} : memref<3x16x128xf32, #tpu.memory_space<vmem>>, vector<1x16x128xf32>,
    %c0_8 = arith.constant 0 : index
    %c0_9 = arith.constant 0 : index
    %c0_10 = arith.constant 0 : index
    %6 = vector.load %arg5[%c0_8, %c0_9, %c0_10] : memref<2x1x128xf32, #tpu.memory_space<vmem>>, vector<1x1x128xf32>
    %7 = vector.shape_cast %6 : vector<1x1x128xf32> to vector<1x128xf32>
    %8 = arith.mulf %0, %0 : vector<16x128xf32>
    %cst = arith.constant dense<0.000000e+00> : vector<16xf32>
    %9 = vector.multi_reduction <add>, %8, %cst [1] : vector<16x128xf32> to vector<16xf32>
    %10 = vector.shape_cast %9 : vector<16xf32> to vector<16x1xf32>
    %cst_11 = arith.constant 1.280000e+02 : f32
    %11 = vector.broadcast %cst_11 : f32 to vector<16x1xf32>
    %12 = arith.divf %10, %11 : vector<16x1xf32>
    %cst_12 = arith.constant 9.99999974E-6 : f32
    %13 = vector.broadcast %cst_12 : f32 to vector<16x1xf32>
    %14 = arith.addf %12, %13 : vector<16x1xf32>
    %15 = math.rsqrt %14 : vector<16x1xf32>
    %16 = vector.broadcast %15 : vector<16x1xf32> to vector<16x128xf32>
    %17 = arith.mulf %0, %16 : vector<16x128xf32>
    %18 = vector.broadcast %7 : vector<1x128xf32> to vector<16x128xf32>
    %19 = arith.mulf %17, %18 : vector<16x128xf32>
    %c0_13 = arith.constant 0 : index
    %c0_14 = arith.constant 0 : index
    %c0_15 = arith.constant 0 : index
    %20 = vector.load %arg6[%c0_13, %c0_14, %c0_15] : memref<2x128x256xbf16, #tpu.memory_space<vmem>>, vector<1x128x256xbf16>
    %21 = vector.shape_cast %20 : vector<1x128x256xbf16> to vector<128x256xbf16>
    %22 = arith.truncf %19 : vector<16x128xf32> to vector<16x128xbf16>
    %cst_16 = arith.constant dense<0.000000e+00> : vector<16x256xf32>
    %23 = tpu.matmul %22, %21, %cst_16 {dimension_numbers = #tpu.dot_dimension_numbers<[1], [0], [0], [1], [0, 0, 1, 1], [], []>} : vector<16x128xbf16>, vector<128x256xbf16>, vector<16x256xf32> -> vector<16x256xf32>
    %c0_17 = arith.constant 0 : index
    %c0_18 = arith.constant 0 : index
    %c0_19 = arith.constant 0 : index
    %24 = vector.load %arg7[%c0_17, %c0_18, %c0_19] : memref<2x1x256xf32, #tpu.memory_space<vmem>>, vector<1x1x256xf32>
    %25 = vector.shape_cast %24 : vector<1x1x256xf32> to vector<1x256xf32>
    %26 = vector.broadcast %25 : vector<1x256xf32> to vector<16x256xf32>
    %27 = arith.addf %23, %26 : vector<16x256xf32>
    %c0_20 = arith.constant 0 : index
    %c0_21 = arith.constant 0 : index
    %c0_22 = arith.constant 0 : index
    %28 = vector.load %arg8[%c0_20, %c0_21, %c0_22] : memref<2x128x256xbf16, #tpu.memory_space<vmem>>, vector<1x128x256xbf16>
    %29 = vector.shape_cast %28 : vector<1x128x256xbf16> to vector<128x256xbf16>
    %30 = arith.truncf %19 : vector<16x128xf32> to vector<16x128xbf16>
    %cst_23 = arith.constant dense<0.000000e+00> : vector<16x256xf32>
    %31 = tpu.matmul %30, %29, %cst_23 {dimension_numbers = #tpu.dot_dimension_numbers<[1], [0], [0], [1], [0, 0, 1, 1], [], []>} : vector<16x128xbf16>, vector<128x256xbf16>, vector<16x256xf32> -> vector<16x256xf32>
    %c0_24 = arith.constant 0 : index
    %c0_25 = arith.constant 0 : index
    %c0_26 = arith.constant 0 : index
    %32 = vector.load %arg9[%c0_24, %c0_25, %c0_26] : memref<2x1x256xf32, #tpu.memory_space<vmem>>, vector<1x1x256xf32>
    %33 = vector.shape_cast %32 : vector<1x1x256xf32> to vector<1x256xf32>
    %34 = vector.broadcast %33 : vector<1x256xf32> to vector<16x256xf32>
    %35 = arith.addf %31, %34 : vector<16x256xf32>
    %36 = arith.mulf %27, %1 : vector<16x256xf32>
    %37 = arith.mulf %35, %2 : vector<16x256xf32>
    %38 = arith.addf %36, %37 : vector<16x256xf32>
    %39 = vector.extract_strided_slice %38 {offsets = [0, 0], sizes = [16, 128], strides = [1, 1]} : vector<16x256xf32> to vector<16x128xf32>
    %40 = vector.extract_strided_slice %38 {offsets = [0, 128], sizes = [16, 64], strides = [1, 1]} : vector<16x256xf32> to vector<16x64xf32>
    %41 = vector.extract_strided_slice %38 {offsets = [0, 192], sizes = [16, 64], strides = [1, 1]} : vector<16x256xf32> to vector<16x64xf32>
    %42 = vector.extract_strided_slice %40 {offsets = [0, 0], sizes = [8, 64], strides = [1, 1]} : vector<16x64xf32> to vector<8x64xf32>
    %43 = arith.truncf %42 : vector<8x64xf32> to vector<8x64xbf16>
    %44 = vector.extract_strided_slice %41 {offsets = [0, 0], sizes = [8, 64], strides = [1, 1]} : vector<16x64xf32> to vector<8x64xf32>
    %45 = arith.truncf %44 : vector<8x64xf32> to vector<8x64xbf16>
    %46 = vector.extract_strided_slice %39 {offsets = [0, 0], sizes = [8, 64], strides = [1, 1]} : vector<16x128xf32> to vector<8x64xf32>
    %47 = vector.extract_strided_slice %39 {offsets = [0, 64], sizes = [8, 64], strides = [1, 1]} : vector<16x128xf32> to vector<8x64xf32>
    %48 = tpu.concatenate %46, %47 in 0 : vector<8x64xf32>, vector<8x64xf32> -> vector<16x64xf32>
    %49 = arith.truncf %48 : vector<16x64xf32> to vector<16x64xbf16>
    %cst_27 = arith.constant dense<0.000000e+00> : vector<16x8xf32>
    %50 = tpu.matmul %49, %43, %cst_27 {dimension_numbers = #tpu.dot_dimension_numbers<[1], [1], [0], [0], [0, 0, 1, 0], [], []>} : vector<16x64xbf16>, vector<8x64xbf16>, vector<16x8xf32> -> vector<16x8xf32>
    %cst_28 = arith.constant 1.250000e-01 : f32
    %51 = vector.broadcast %cst_28 : f32 to vector<16x8xf32>
    %52 = arith.mulf %50, %51 : vector<16x8xf32>
    %c0_29 = arith.constant 0 : index
    %c0_30 = arith.constant 0 : index
    %c0_31 = arith.constant 0 : index
    %53 = vector.load %arg2[%c0_29, %c0_30, %c0_31] : memref<2x16x8xf32, #tpu.memory_space<vmem>>, vector<1x16x8xf32>
    %54 = vector.shape_cast %53 : vector<1x16x8xf32> to vector<16x8xf32>
    %55 = arith.addf %52, %54 : vector<16x8xf32>
    %cst_32 = arith.constant dense<0xFF800000> : vector<16xf32>
    %56 = vector.multi_reduction <maximumf>, %55, %cst_32 [1] : vector<16x8xf32> to vector<16xf32>
    %57 = vector.shape_cast %56 : vector<16xf32> to vector<16x1xf32>
    %58 = vector.broadcast %57 : vector<16x1xf32> to vector<16x8xf32>
    %59 = arith.subf %55, %58 : vector<16x8xf32>
    %60 = math.exp %59 : vector<16x8xf32>
    %cst_33 = arith.constant dense<0.000000e+00> : vector<16xf32>
    %61 = vector.multi_reduction <add>, %60, %cst_33 [1] : vector<16x8xf32> to vector<16xf32>
    %62 = vector.shape_cast %61 : vector<16xf32> to vector<16x1xf32>
    %63 = tpu.reciprocal %62 {approx = true} : vector<16x1xf32> -> vector<16x1xf32>
    %64 = vector.broadcast %63 : vector<16x1xf32> to vector<16x8xf32>
    %65 = arith.mulf %60, %64 : vector<16x8xf32>
    %66 = arith.truncf %65 : vector<16x8xf32> to vector<16x8xbf16>
    %cst_34 = arith.constant dense<0.000000e+00> : vector<16x64xf32>
    %67 = tpu.matmul %66, %45, %cst_34 {dimension_numbers = #tpu.dot_dimension_numbers<[1], [0], [0], [1], [0, 0, 1, 1], [], []>} : vector<16x8xbf16>, vector<8x64xbf16>, vector<16x64xf32> -> vector<16x64xf32>
    %68 = vector.extract_strided_slice %67 {offsets = [0, 0], sizes = [8, 64], strides = [1, 1]} : vector<16x64xf32> to vector<8x64xf32>
    %69 = vector.extract_strided_slice %67 {offsets = [8, 0], sizes = [8, 64], strides = [1, 1]} : vector<16x64xf32> to vector<8x64xf32>
    %70 = tpu.concatenate %68, %69 in 1 : vector<8x64xf32>, vector<8x64xf32> -> vector<8x128xf32>
    %71 = vector.extract_strided_slice %40 {offsets = [8, 0], sizes = [8, 64], strides = [1, 1]} : vector<16x64xf32> to vector<8x64xf32>
    %72 = arith.truncf %71 : vector<8x64xf32> to vector<8x64xbf16>
    %73 = vector.extract_strided_slice %41 {offsets = [8, 0], sizes = [8, 64], strides = [1, 1]} : vector<16x64xf32> to vector<8x64xf32>
    %74 = arith.truncf %73 : vector<8x64xf32> to vector<8x64xbf16>
    %75 = vector.extract_strided_slice %39 {offsets = [8, 0], sizes = [8, 64], strides = [1, 1]} : vector<16x128xf32> to vector<8x64xf32>
    %76 = vector.extract_strided_slice %39 {offsets = [8, 64], sizes = [8, 64], strides = [1, 1]} : vector<16x128xf32> to vector<8x64xf32>
    %77 = tpu.concatenate %75, %76 in 0 : vector<8x64xf32>, vector<8x64xf32> -> vector<16x64xf32>
    %78 = arith.truncf %77 : vector<16x64xf32> to vector<16x64xbf16>
    %cst_35 = arith.constant dense<0.000000e+00> : vector<16x8xf32>
    %79 = tpu.matmul %78, %72, %cst_35 {dimension_numbers = #tpu.dot_dimension_numbers<[1], [1], [0], [0], [0, 0, 1, 0], [], []>} : vector<16x64xbf16>, vector<8x64xbf16>, vector<16x8xf32> -> vector<16x8xf32>
    %cst_36 = arith.constant 1.250000e-01 : f32
    %80 = vector.broadcast %cst_36 : f32 to vector<16x8xf32>
    %81 = arith.mulf %79, %80 : vector<16x8xf32>
    %c1 = arith.constant 1 : index
    %c0_37 = arith.constant 0 : index
    %c0_38 = arith.constant 0 : index
    %82 = vector.load %arg2[%c1, %c0_37, %c0_38] : memref<2x16x8xf32, #tpu.memory_space<vmem>>, vector<1x16x8xf32>
    %83 = vector.shape_cast %82 : vector<1x16x8xf32> to vector<16x8xf32>
    %84 = arith.addf %81, %83 : vector<16x8xf32>
    %cst_39 = arith.constant dense<0xFF800000> : vector<16xf32>
    %85 = vector.multi_reduction <maximumf>, %84, %cst_39 [1] : vector<16x8xf32> to vector<16xf32>
    %86 = vector.shape_cast %85 : vector<16xf32> to vector<16x1xf32>
    %87 = vector.broadcast %86 : vector<16x1xf32> to vector<16x8xf32>
    %88 = arith.subf %84, %87 : vector<16x8xf32>
    %89 = math.exp %88 : vector<16x8xf32>
    %cst_40 = arith.constant dense<0.000000e+00> : vector<16xf32>
    %90 = vector.multi_reduction <add>, %89, %cst_40 [1] : vector<16x8xf32> to vector<16xf32>
    %91 = vector.shape_cast %90 : vector<16xf32> to vector<16x1xf32>
    %92 = tpu.reciprocal %91 {approx = true} : vector<16x1xf32> -> vector<16x1xf32>
    %93 = vector.broadcast %92 : vector<16x1xf32> to vector<16x8xf32>
    %94 = arith.mulf %89, %93 : vector<16x8xf32>
    %95 = arith.truncf %94 : vector<16x8xf32> to vector<16x8xbf16>
    %cst_41 = arith.constant dense<0.000000e+00> : vector<16x64xf32>
    %96 = tpu.matmul %95, %74, %cst_41 {dimension_numbers = #tpu.dot_dimension_numbers<[1], [0], [0], [1], [0, 0, 1, 1], [], []>} : vector<16x8xbf16>, vector<8x64xbf16>, vector<16x64xf32> -> vector<16x64xf32>
    %97 = vector.extract_strided_slice %96 {offsets = [0, 0], sizes = [8, 64], strides = [1, 1]} : vector<16x64xf32> to vector<8x64xf32>
    %98 = vector.extract_strided_slice %96 {offsets = [8, 0], sizes = [8, 64], strides = [1, 1]} : vector<16x64xf32> to vector<8x64xf32>
    %99 = tpu.concatenate %97, %98 in 1 : vector<8x64xf32>, vector<8x64xf32> -> vector<8x128xf32>
    %100 = tpu.concatenate %70, %99 in 0 : vector<8x128xf32>, vector<8x128xf32> -> vector<16x128xf32>
    %c0_42 = arith.constant 0 : index
    %c0_43 = arith.constant 0 : index
    %c0_44 = arith.constant 0 : index
    %101 = vector.load %arg10[%c0_42, %c0_43, %c0_44] : memref<2x128x128xbf16, #tpu.memory_space<vmem>>, vector<1x128x128xbf16>
    %102 = vector.shape_cast %101 : vector<1x128x128xbf16> to vector<128x128xbf16>
    %103 = arith.truncf %100 : vector<16x128xf32> to vector<16x128xbf16>
    %cst_45 = arith.constant dense<0.000000e+00> : vector<16x128xf32>
    %104 = tpu.matmul %103, %102, %cst_45 {dimension_numbers = #tpu.dot_dimension_numbers<[1], [0], [0], [1], [0, 0, 1, 1], [], []>} : vector<16x128xbf16>, vector<128x128xbf16>, vector<16x128xf32> -> vector<16x128xf32>
    %105 = arith.addf %0, %104 : vector<16x128xf32>
    %c0_46 = arith.constant 0 : index
    %c0_47 = arith.constant 0 : index
    %c0_48 = arith.constant 0 : index
    %106 = vector.load %arg11[%c0_46, %c0_47, %c0_48] : memref<2x1x128xf32, #tpu.memory_space<vmem>>, vector<1x1x128xf32>
    %107 = vector.shape_cast %106 : vector<1x1x128xf32> to vector<1x128xf32>
    %108 = arith.mulf %105, %105 : vector<16x128xf32>
    %cst_49 = arith.constant dense<0.000000e+00> : vector<16xf32>
    %109 = vector.multi_reduction <add>, %108, %cst_49 [1] : vector<16x128xf32> to vector<16xf32>
    %110 = vector.shape_cast %109 : vector<16xf32> to vector<16x1xf32>
    %cst_50 = arith.constant 1.280000e+02 : f32
    %111 = vector.broadcast %cst_50 : f32 to vector<16x1xf32>
    %112 = arith.divf %110, %111 : vector<16x1xf32>
    %cst_51 = arith.constant 9.99999974E-6 : f32
    %113 = vector.broadcast %cst_51 : f32 to vector<16x1xf32>
    %114 = arith.addf %112, %113 : vector<16x1xf32>
    %115 = math.rsqrt %114 : vector<16x1xf32>
    %116 = vector.broadcast %115 : vector<16x1xf32> to vector<16x128xf32>
    %117 = arith.mulf %105, %116 : vector<16x128xf32>
    %118 = vector.broadcast %107 : vector<1x128xf32> to vector<16x128xf32>
    %119 = arith.mulf %117, %118 : vector<16x128xf32>
    %c0_52 = arith.constant 0 : index
    %c0_53 = arith.constant 0 : index
    %c0_54 = arith.constant 0 : index
    %120 = vector.load %arg12[%c0_52, %c0_53, %c0_54] : memref<2x128x256xbf16, #tpu.memory_space<vmem>>, vector<1x128x256xbf16>
    %121 = vector.shape_cast %120 : vector<1x128x256xbf16> to vector<128x256xbf16>
    %122 = arith.truncf %119 : vector<16x128xf32> to vector<16x128xbf16>
    %cst_55 = arith.constant dense<0.000000e+00> : vector<16x256xf32>
    %123 = tpu.matmul %122, %121, %cst_55 {dimension_numbers = #tpu.dot_dimension_numbers<[1], [0], [0], [1], [0, 0, 1, 1], [], []>} : vector<16x128xbf16>, vector<128x256xbf16>, vector<16x256xf32> -> vector<16x256xf32>
    %124 = vector.extract_strided_slice %123 {offsets = [0, 0], sizes = [16, 128], strides = [1, 1]} : vector<16x256xf32> to vector<16x128xf32>
    %125 = vector.extract_strided_slice %123 {offsets = [0, 128], sizes = [16, 128], strides = [1, 1]} : vector<16x256xf32> to vector<16x128xf32>
    %126 = arith.negf %124 : vector<16x128xf32>
    %127 = math.exp %126 : vector<16x128xf32>
    %cst_56 = arith.constant 1.000000e+00 : f32
    %128 = vector.broadcast %cst_56 : f32 to vector<16x128xf32>
    %129 = arith.addf %128, %127 : vector<16x128xf32>
    %130 = arith.divf %128, %129 : vector<16x128xf32>
    %131 = arith.mulf %124, %130 : vector<16x128xf32>
    %132 = arith.mulf %131, %125 : vector<16x128xf32>
    %c0_57 = arith.constant 0 : index
    %c0_58 = arith.constant 0 : index
    %c0_59 = arith.constant 0 : index
    %133 = vector.load %arg13[%c0_57, %c0_58, %c0_59] : memref<2x128x128xbf16, #tpu.memory_space<vmem>>, vector<1x128x128xbf16>
    %134 = vector.shape_cast %133 : vector<1x128x128xbf16> to vector<128x128xbf16>
    %135 = arith.truncf %132 : vector<16x128xf32> to vector<16x128xbf16>
    %cst_60 = arith.constant dense<0.000000e+00> : vector<16x128xf32>
    %136 = tpu.matmul %135, %134, %cst_60 {dimension_numbers = #tpu.dot_dimension_numbers<[1], [0], [0], [1], [0, 0, 1, 1], [], []>} : vector<16x128xbf16>, vector<128x128xbf16>, vector<16x128xf32> -> vector<16x128xf32>
    %137 = arith.addf %105, %136 : vector<16x128xf32>
    %c1_61 = arith.constant 1 : index
    %c0_62 = arith.constant 0 : index
    %c0_63 = arith.constant 0 : index
    %138 = vector.load %arg15[%c1_61, %c0_62, %c0_63] : memref<3x16x128xf32, #tpu.memory_space<vmem>>, vector<1x16x128xf32>
    %139 = vector.shape_cast %138 : vector<1x16x128xf32> to vector<16x128xf32>
    %140 = vector.shape_cast %137 : vector<16x128xf32> to vector<1x16x128xf32>
    tpu.vector_store %arg15[%c1_61, %c0_62, %c0_63], %140 {strides = array<i32>} : memref<3x16x128xf32, #tpu.memory_space<vmem>>, vector<1x16x128xf32>,
    %c1_64 = arith.constant 1 : index
    %c0_65 = arith.constant 0 : index
    %c0_66 = arith.constant 0 : index
    %141 = vector.load %arg5[%c1_64, %c0_65, %c0_66] : memref<2x1x128xf32, #tpu.memory_space<vmem>>, vector<1x1x128xf32>
    %142 = vector.shape_cast %141 : vector<1x1x128xf32> to vector<1x128xf32>
    %143 = arith.mulf %137, %137 : vector<16x128xf32>
    %cst_67 = arith.constant dense<0.000000e+00> : vector<16xf32>
    %144 = vector.multi_reduction <add>, %143, %cst_67 [1] : vector<16x128xf32> to vector<16xf32>
    %145 = vector.shape_cast %144 : vector<16xf32> to vector<16x1xf32>
    %cst_68 = arith.constant 1.280000e+02 : f32
    %146 = vector.broadcast %cst_68 : f32 to vector<16x1xf32>
    %147 = arith.divf %145, %146 : vector<16x1xf32>
    %cst_69 = arith.constant 9.99999974E-6 : f32
    %148 = vector.broadcast %cst_69 : f32 to vector<16x1xf32>
    %149 = arith.addf %147, %148 : vector<16x1xf32>
    %150 = math.rsqrt %149 : vector<16x1xf32>
    %151 = vector.broadcast %150 : vector<16x1xf32> to vector<16x128xf32>
    %152 = arith.mulf %137, %151 : vector<16x128xf32>
    %153 = vector.broadcast %142 : vector<1x128xf32> to vector<16x128xf32>
    %154 = arith.mulf %152, %153 : vector<16x128xf32>
    %c1_70 = arith.constant 1 : index
    %c0_71 = arith.constant 0 : index
    %c0_72 = arith.constant 0 : index
    %155 = vector.load %arg6[%c1_70, %c0_71, %c0_72] : memref<2x128x256xbf16, #tpu.memory_space<vmem>>, vector<1x128x256xbf16>
    %156 = vector.shape_cast %155 : vector<1x128x256xbf16> to vector<128x256xbf16>
    %157 = arith.truncf %154 : vector<16x128xf32> to vector<16x128xbf16>
    %cst_73 = arith.constant dense<0.000000e+00> : vector<16x256xf32>
    %158 = tpu.matmul %157, %156, %cst_73 {dimension_numbers = #tpu.dot_dimension_numbers<[1], [0], [0], [1], [0, 0, 1, 1], [], []>} : vector<16x128xbf16>, vector<128x256xbf16>, vector<16x256xf32> -> vector<16x256xf32>
    %c1_74 = arith.constant 1 : index
    %c0_75 = arith.constant 0 : index
    %c0_76 = arith.constant 0 : index
    %159 = vector.load %arg7[%c1_74, %c0_75, %c0_76] : memref<2x1x256xf32, #tpu.memory_space<vmem>>, vector<1x1x256xf32>
    %160 = vector.shape_cast %159 : vector<1x1x256xf32> to vector<1x256xf32>
    %161 = vector.broadcast %160 : vector<1x256xf32> to vector<16x256xf32>
    %162 = arith.addf %158, %161 : vector<16x256xf32>
    %c1_77 = arith.constant 1 : index
    %c0_78 = arith.constant 0 : index
    %c0_79 = arith.constant 0 : index
    %163 = vector.load %arg8[%c1_77, %c0_78, %c0_79] : memref<2x128x256xbf16, #tpu.memory_space<vmem>>, vector<1x128x256xbf16>
    %164 = vector.shape_cast %163 : vector<1x128x256xbf16> to vector<128x256xbf16>
    %165 = arith.truncf %154 : vector<16x128xf32> to vector<16x128xbf16>
    %cst_80 = arith.constant dense<0.000000e+00> : vector<16x256xf32>
    %166 = tpu.matmul %165, %164, %cst_80 {dimension_numbers = #tpu.dot_dimension_numbers<[1], [0], [0], [1], [0, 0, 1, 1], [], []>} : vector<16x128xbf16>, vector<128x256xbf16>, vector<16x256xf32> -> vector<16x256xf32>
    %c1_81 = arith.constant 1 : index
    %c0_82 = arith.constant 0 : index
    %c0_83 = arith.constant 0 : index
    %167 = vector.load %arg9[%c1_81, %c0_82, %c0_83] : memref<2x1x256xf32, #tpu.memory_space<vmem>>, vector<1x1x256xf32>
    %168 = vector.shape_cast %167 : vector<1x1x256xf32> to vector<1x256xf32>
    %169 = vector.broadcast %168 : vector<1x256xf32> to vector<16x256xf32>
    %170 = arith.addf %166, %169 : vector<16x256xf32>
    %171 = arith.mulf %162, %1 : vector<16x256xf32>
    %172 = arith.mulf %170, %2 : vector<16x256xf32>
    %173 = arith.addf %171, %172 : vector<16x256xf32>
    %174 = vector.extract_strided_slice %173 {offsets = [0, 0], sizes = [16, 128], strides = [1, 1]} : vector<16x256xf32> to vector<16x128xf32>
    %175 = vector.extract_strided_slice %173 {offsets = [0, 128], sizes = [16, 64], strides = [1, 1]} : vector<16x256xf32> to vector<16x64xf32>
    %176 = vector.extract_strided_slice %173 {offsets = [0, 192], sizes = [16, 64], strides = [1, 1]} : vector<16x256xf32> to vector<16x64xf32>
    %177 = vector.extract_strided_slice %175 {offsets = [0, 0], sizes = [8, 64], strides = [1, 1]} : vector<16x64xf32> to vector<8x64xf32>
    %178 = arith.truncf %177 : vector<8x64xf32> to vector<8x64xbf16>
    %179 = vector.extract_strided_slice %176 {offsets = [0, 0], sizes = [8, 64], strides = [1, 1]} : vector<16x64xf32> to vector<8x64xf32>
    %180 = arith.truncf %179 : vector<8x64xf32> to vector<8x64xbf16>
    %181 = vector.extract_strided_slice %174 {offsets = [0, 0], sizes = [8, 64], strides = [1, 1]} : vector<16x128xf32> to vector<8x64xf32>
    %182 = vector.extract_strided_slice %174 {offsets = [0, 64], sizes = [8, 64], strides = [1, 1]} : vector<16x128xf32> to vector<8x64xf32>
    %183 = tpu.concatenate %181, %182 in 0 : vector<8x64xf32>, vector<8x64xf32> -> vector<16x64xf32>
    %184 = arith.truncf %183 : vector<16x64xf32> to vector<16x64xbf16>
    %cst_84 = arith.constant dense<0.000000e+00> : vector<16x8xf32>
    %185 = tpu.matmul %184, %178, %cst_84 {dimension_numbers = #tpu.dot_dimension_numbers<[1], [1], [0], [0], [0, 0, 1, 0], [], []>} : vector<16x64xbf16>, vector<8x64xbf16>, vector<16x8xf32> -> vector<16x8xf32>
    %cst_85 = arith.constant 1.250000e-01 : f32
    %186 = vector.broadcast %cst_85 : f32 to vector<16x8xf32>
    %187 = arith.mulf %185, %186 : vector<16x8xf32>
    %c0_86 = arith.constant 0 : index
    %c0_87 = arith.constant 0 : index
    %c0_88 = arith.constant 0 : index
    %188 = vector.load %arg2[%c0_86, %c0_87, %c0_88] : memref<2x16x8xf32, #tpu.memory_space<vmem>>, vector<1x16x8xf32>
    %189 = vector.shape_cast %188 : vector<1x16x8xf32> to vector<16x8xf32>
    %190 = arith.addf %187, %189 : vector<16x8xf32>
    %cst_89 = arith.constant dense<0xFF800000> : vector<16xf32>
    %191 = vector.multi_reduction <maximumf>, %190, %cst_89 [1] : vector<16x8xf32> to vector<16xf32>
    %192 = vector.shape_cast %191 : vector<16xf32> to vector<16x1xf32>
    %193 = vector.broadcast %192 : vector<16x1xf32> to vector<16x8xf32>
    %194 = arith.subf %190, %193 : vector<16x8xf32>
    %195 = math.exp %194 : vector<16x8xf32>
    %cst_90 = arith.constant dense<0.000000e+00> : vector<16xf32>
    %196 = vector.multi_reduction <add>, %195, %cst_90 [1] : vector<16x8xf32> to vector<16xf32>
    %197 = vector.shape_cast %196 : vector<16xf32> to vector<16x1xf32>
    %198 = tpu.reciprocal %197 {approx = true} : vector<16x1xf32> -> vector<16x1xf32>
    %199 = vector.broadcast %198 : vector<16x1xf32> to vector<16x8xf32>
    %200 = arith.mulf %195, %199 : vector<16x8xf32>
    %201 = arith.truncf %200 : vector<16x8xf32> to vector<16x8xbf16>
    %cst_91 = arith.constant dense<0.000000e+00> : vector<16x64xf32>
    %202 = tpu.matmul %201, %180, %cst_91 {dimension_numbers = #tpu.dot_dimension_numbers<[1], [0], [0], [1], [0, 0, 1, 1], [], []>} : vector<16x8xbf16>, vector<8x64xbf16>, vector<16x64xf32> -> vector<16x64xf32>
    %203 = vector.extract_strided_slice %202 {offsets = [0, 0], sizes = [8, 64], strides = [1, 1]} : vector<16x64xf32> to vector<8x64xf32>
    %204 = vector.extract_strided_slice %202 {offsets = [8, 0], sizes = [8, 64], strides = [1, 1]} : vector<16x64xf32> to vector<8x64xf32>
    %205 = tpu.concatenate %203, %204 in 1 : vector<8x64xf32>, vector<8x64xf32> -> vector<8x128xf32>
    %206 = vector.extract_strided_slice %175 {offsets = [8, 0], sizes = [8, 64], strides = [1, 1]} : vector<16x64xf32> to vector<8x64xf32>
    %207 = arith.truncf %206 : vector<8x64xf32> to vector<8x64xbf16>
    %208 = vector.extract_strided_slice %176 {offsets = [8, 0], sizes = [8, 64], strides = [1, 1]} : vector<16x64xf32> to vector<8x64xf32>
    %209 = arith.truncf %208 : vector<8x64xf32> to vector<8x64xbf16>
    %210 = vector.extract_strided_slice %174 {offsets = [8, 0], sizes = [8, 64], strides = [1, 1]} : vector<16x128xf32> to vector<8x64xf32>
    %211 = vector.extract_strided_slice %174 {offsets = [8, 64], sizes = [8, 64], strides = [1, 1]} : vector<16x128xf32> to vector<8x64xf32>
    %212 = tpu.concatenate %210, %211 in 0 : vector<8x64xf32>, vector<8x64xf32> -> vector<16x64xf32>
    %213 = arith.truncf %212 : vector<16x64xf32> to vector<16x64xbf16>
    %cst_92 = arith.constant dense<0.000000e+00> : vector<16x8xf32>
    %214 = tpu.matmul %213, %207, %cst_92 {dimension_numbers = #tpu.dot_dimension_numbers<[1], [1], [0], [0], [0, 0, 1, 0], [], []>} : vector<16x64xbf16>, vector<8x64xbf16>, vector<16x8xf32> -> vector<16x8xf32>
    %cst_93 = arith.constant 1.250000e-01 : f32
    %215 = vector.broadcast %cst_93 : f32 to vector<16x8xf32>
    %216 = arith.mulf %214, %215 : vector<16x8xf32>
    %c1_94 = arith.constant 1 : index
    %c0_95 = arith.constant 0 : index
    %c0_96 = arith.constant 0 : index
    %217 = vector.load %arg2[%c1_94, %c0_95, %c0_96] : memref<2x16x8xf32, #tpu.memory_space<vmem>>, vector<1x16x8xf32>
    %218 = vector.shape_cast %217 : vector<1x16x8xf32> to vector<16x8xf32>
    %219 = arith.addf %216, %218 : vector<16x8xf32>
    %cst_97 = arith.constant dense<0xFF800000> : vector<16xf32>
    %220 = vector.multi_reduction <maximumf>, %219, %cst_97 [1] : vector<16x8xf32> to vector<16xf32>
    %221 = vector.shape_cast %220 : vector<16xf32> to vector<16x1xf32>
    %222 = vector.broadcast %221 : vector<16x1xf32> to vector<16x8xf32>
    %223 = arith.subf %219, %222 : vector<16x8xf32>
    %224 = math.exp %223 : vector<16x8xf32>
    %cst_98 = arith.constant dense<0.000000e+00> : vector<16xf32>
    %225 = vector.multi_reduction <add>, %224, %cst_98 [1] : vector<16x8xf32> to vector<16xf32>
    %226 = vector.shape_cast %225 : vector<16xf32> to vector<16x1xf32>
    %227 = tpu.reciprocal %226 {approx = true} : vector<16x1xf32> -> vector<16x1xf32>
    %228 = vector.broadcast %227 : vector<16x1xf32> to vector<16x8xf32>
    %229 = arith.mulf %224, %228 : vector<16x8xf32>
    %230 = arith.truncf %229 : vector<16x8xf32> to vector<16x8xbf16>
    %cst_99 = arith.constant dense<0.000000e+00> : vector<16x64xf32>
    %231 = tpu.matmul %230, %209, %cst_99 {dimension_numbers = #tpu.dot_dimension_numbers<[1], [0], [0], [1], [0, 0, 1, 1], [], []>} : vector<16x8xbf16>, vector<8x64xbf16>, vector<16x64xf32> -> vector<16x64xf32>
    %232 = vector.extract_strided_slice %231 {offsets = [0, 0], sizes = [8, 64], strides = [1, 1]} : vector<16x64xf32> to vector<8x64xf32>
    %233 = vector.extract_strided_slice %231 {offsets = [8, 0], sizes = [8, 64], strides = [1, 1]} : vector<16x64xf32> to vector<8x64xf32>
    %234 = tpu.concatenate %232, %233 in 1 : vector<8x64xf32>, vector<8x64xf32> -> vector<8x128xf32>
    %235 = tpu.concatenate %205, %234 in 0 : vector<8x128xf32>, vector<8x128xf32> -> vector<16x128xf32>
    %c1_100 = arith.constant 1 : index
    %c0_101 = arith.constant 0 : index
    %c0_102 = arith.constant 0 : index
    %236 = vector.load %arg10[%c1_100, %c0_101, %c0_102] : memref<2x128x128xbf16, #tpu.memory_space<vmem>>, vector<1x128x128xbf16>
    %237 = vector.shape_cast %236 : vector<1x128x128xbf16> to vector<128x128xbf16>
    %238 = arith.truncf %235 : vector<16x128xf32> to vector<16x128xbf16>
    %cst_103 = arith.constant dense<0.000000e+00> : vector<16x128xf32>
    %239 = tpu.matmul %238, %237, %cst_103 {dimension_numbers = #tpu.dot_dimension_numbers<[1], [0], [0], [1], [0, 0, 1, 1], [], []>} : vector<16x128xbf16>, vector<128x128xbf16>, vector<16x128xf32> -> vector<16x128xf32>
    %240 = arith.addf %137, %239 : vector<16x128xf32>
    %c1_104 = arith.constant 1 : index
    %c0_105 = arith.constant 0 : index
    %c0_106 = arith.constant 0 : index
    %241 = vector.load %arg11[%c1_104, %c0_105, %c0_106] : memref<2x1x128xf32, #tpu.memory_space<vmem>>, vector<1x1x128xf32>
    %242 = vector.shape_cast %241 : vector<1x1x128xf32> to vector<1x128xf32>
    %243 = arith.mulf %240, %240 : vector<16x128xf32>
    %cst_107 = arith.constant dense<0.000000e+00> : vector<16xf32>
    %244 = vector.multi_reduction <add>, %243, %cst_107 [1] : vector<16x128xf32> to vector<16xf32>
    %245 = vector.shape_cast %244 : vector<16xf32> to vector<16x1xf32>
    %cst_108 = arith.constant 1.280000e+02 : f32
    %246 = vector.broadcast %cst_108 : f32 to vector<16x1xf32>
    %247 = arith.divf %245, %246 : vector<16x1xf32>
    %cst_109 = arith.constant 9.99999974E-6 : f32
    %248 = vector.broadcast %cst_109 : f32 to vector<16x1xf32>
    %249 = arith.addf %247, %248 : vector<16x1xf32>
    %250 = math.rsqrt %249 : vector<16x1xf32>
    %251 = vector.broadcast %250 : vector<16x1xf32> to vector<16x128xf32>
    %252 = arith.mulf %240, %251 : vector<16x128xf32>
    %253 = vector.broadcast %242 : vector<1x128xf32> to vector<16x128xf32>
    %254 = arith.mulf %252, %253 : vector<16x128xf32>
    %c1_110 = arith.constant 1 : index
    %c0_111 = arith.constant 0 : index
    %c0_112 = arith.constant 0 : index
    %255 = vector.load %arg12[%c1_110, %c0_111, %c0_112] : memref<2x128x256xbf16, #tpu.memory_space<vmem>>, vector<1x128x256xbf16>
    %256 = vector.shape_cast %255 : vector<1x128x256xbf16> to vector<128x256xbf16>
    %257 = arith.truncf %254 : vector<16x128xf32> to vector<16x128xbf16>
    %cst_113 = arith.constant dense<0.000000e+00> : vector<16x256xf32>
    %258 = tpu.matmul %257, %256, %cst_113 {dimension_numbers = #tpu.dot_dimension_numbers<[1], [0], [0], [1], [0, 0, 1, 1], [], []>} : vector<16x128xbf16>, vector<128x256xbf16>, vector<16x256xf32> -> vector<16x256xf32>
    %259 = vector.extract_strided_slice %258 {offsets = [0, 0], sizes = [16, 128], strides = [1, 1]} : vector<16x256xf32> to vector<16x128xf32>
    %260 = vector.extract_strided_slice %258 {offsets = [0, 128], sizes = [16, 128], strides = [1, 1]} : vector<16x256xf32> to vector<16x128xf32>
    %261 = arith.negf %259 : vector<16x128xf32>
    %262 = math.exp %261 : vector<16x128xf32>
    %cst_114 = arith.constant 1.000000e+00 : f32
    %263 = vector.broadcast %cst_114 : f32 to vector<16x128xf32>
    %264 = arith.addf %263, %262 : vector<16x128xf32>
    %265 = arith.divf %263, %264 : vector<16x128xf32>
    %266 = arith.mulf %259, %265 : vector<16x128xf32>
    %267 = arith.mulf %266, %260 : vector<16x128xf32>
    %c1_115 = arith.constant 1 : index
    %c0_116 = arith.constant 0 : index
    %c0_117 = arith.constant 0 : index
    %268 = vector.load %arg13[%c1_115, %c0_116, %c0_117] : memref<2x128x128xbf16, #tpu.memory_space<vmem>>, vector<1x128x128xbf16>
    %269 = vector.shape_cast %268 : vector<1x128x128xbf16> to vector<128x128xbf16>
    %270 = arith.truncf %267 : vector<16x128xf32> to vector<16x128xbf16>
    %cst_118 = arith.constant dense<0.000000e+00> : vector<16x128xf32>
    %271 = tpu.matmul %270, %269, %cst_118 {dimension_numbers = #tpu.dot_dimension_numbers<[1], [0], [0], [1], [0, 0, 1, 1], [], []>} : vector<16x128xbf16>, vector<128x128xbf16>, vector<16x128xf32> -> vector<16x128xf32>
    %272 = arith.addf %240, %271 : vector<16x128xf32>
    %c0_119 = arith.constant 0 : index
    %c0_120 = arith.constant 0 : index
    %273 = vector.load %arg14[%c0_119, %c0_120] : memref<1x128xf32, #tpu.memory_space<vmem>>, vector<1x128xf32>
    %274 = arith.mulf %272, %272 : vector<16x128xf32>
    %cst_121 = arith.constant dense<0.000000e+00> : vector<16xf32>
    %275 = vector.multi_reduction <add>, %274, %cst_121 [1] : vector<16x128xf32> to vector<16xf32>
    %276 = vector.shape_cast %275 : vector<16xf32> to vector<16x1xf32>
    %cst_122 = arith.constant 1.280000e+02 : f32
    %277 = vector.broadcast %cst_122 : f32 to vector<16x1xf32>
    %278 = arith.divf %276, %277 : vector<16x1xf32>
    %cst_123 = arith.constant 9.99999974E-6 : f32
    %279 = vector.broadcast %cst_123 : f32 to vector<16x1xf32>
    %280 = arith.addf %278, %279 : vector<16x1xf32>
    %281 = math.rsqrt %280 : vector<16x1xf32>
    %282 = vector.broadcast %281 : vector<16x1xf32> to vector<16x128xf32>
    %283 = arith.mulf %272, %282 : vector<16x128xf32>
    %284 = vector.broadcast %273 : vector<1x128xf32> to vector<16x128xf32>
    %285 = arith.mulf %283, %284 : vector<16x128xf32>
    %c2 = arith.constant 2 : index
    %c0_124 = arith.constant 0 : index
    %c0_125 = arith.constant 0 : index
    %286 = vector.load %arg15[%c2, %c0_124, %c0_125] : memref<3x16x128xf32, #tpu.memory_space<vmem>>, vector<1x16x128xf32>
    %287 = vector.shape_cast %286 : vector<1x16x128xf32> to vector<16x128xf32>
    %288 = vector.shape_cast %285 : vector<16x128xf32> to vector<1x16x128xf32>
    tpu.vector_store %arg15[%c2, %c0_124, %c0_125], %288 {strides = array<i32>} : memref<3x16x128xf32, #tpu.memory_space<vmem>>, vector<1x16x128xf32>,
    return
  }
  func.func @transform_0(%arg0: i32) -> (i32, i32) {
    %c0_i32 = arith.constant 0 : i32
    %c0_i32_0 = arith.constant 0 : i32
    %c0_i32_1 = arith.constant 0 : i32
    return %c0_i32, %c0_i32_0 : i32, i32
  }
  func.func @transform_1(%arg0: i32) -> (i32, i32, i32) {
    %c0_i32 = arith.constant 0 : i32
    %c0_i32_0 = arith.constant 0 : i32
    %c0_i32_1 = arith.constant 0 : i32
    %c0_i32_2 = arith.constant 0 : i32
    return %c0_i32, %c0_i32_0, %c0_i32_1 : i32, i32, i32
  }
  func.func @transform_2(%arg0: i32) -> (i32, i32) {
    %c0_i32 = arith.constant 0 : i32
    %c0_i32_0 = arith.constant 0 : i32
    %c0_i32_1 = arith.constant 0 : i32
    return %c0_i32, %c0_i32_0 : i32, i32
  }
  func.func @transform_3(%arg0: i32) -> (i32, i32) {
    %c0_i32 = arith.constant 0 : i32
    %c0_i32_0 = arith.constant 0 : i32
    %c0_i32_1 = arith.constant 0 : i32
    return %c0_i32, %c0_i32_0 : i32, i32
  }
  func.func @transform_4(%arg0: i32) -> (i32, i32, i32) {
    %c0_i32 = arith.constant 0 : i32
    %c0_i32_0 = arith.constant 0 : i32
    %c0_i32_1 = arith.constant 0 : i32
    %c0_i32_2 = arith.constant 0 : i32
    return %c0_i32, %c0_i32_0, %c0_i32_1 : i32, i32, i32
  }
  func.func @transform_5(%arg0: i32) -> (i32, i32, i32) {
    %c0_i32 = arith.constant 0 : i32
    %c0_i32_0 = arith.constant 0 : i32
    %c0_i32_1 = arith.constant 0 : i32
    %c0_i32_2 = arith.constant 0 : i32
    return %c0_i32, %c0_i32_0, %c0_i32_1 : i32, i32, i32
  }
  func.func @transform_6(%arg0: i32) -> (i32, i32, i32) {
    %c0_i32 = arith.constant 0 : i32
    %c0_i32_0 = arith.constant 0 : i32
    %c0_i32_1 = arith.constant 0 : i32
    %c0_i32_2 = arith.constant 0 : i32
    return %c0_i32, %c0_i32_0, %c0_i32_1 : i32, i32, i32
  }
  func.func @transform_7(%arg0: i32) -> (i32, i32, i32) {
    %c0_i32 = arith.constant 0 : i32
    %c0_i32_0 = arith.constant 0 : i32
    %c0_i32_1 = arith.constant 0 : i32
    %c0_i32_2 = arith.constant 0 : i32
    return %c0_i32, %c0_i32_0, %c0_i32_1 : i32, i32, i32
  }
  func.func @transform_8(%arg0: i32) -> (i32, i32, i32) {
    %c0_i32 = arith.constant 0 : i32
    %c0_i32_0 = arith.constant 0 : i32
    %c0_i32_1 = arith.constant 0 : i32
    %c0_i32_2 = arith.constant 0 : i32
    return %c0_i32, %c0_i32_0, %c0_i32_1 : i32, i32, i32
  }
  func.func @transform_9(%arg0: i32) -> (i32, i32, i32) {
    %c0_i32 = arith.constant 0 : i32
    %c0_i32_0 = arith.constant 0 : i32
    %c0_i32_1 = arith.constant 0 : i32
    %c0_i32_2 = arith.constant 0 : i32
    return %c0_i32, %c0_i32_0, %c0_i32_1 : i32, i32, i32
  }
  func.func @transform_10(%arg0: i32) -> (i32, i32, i32) {
    %c0_i32 = arith.constant 0 : i32
    %c0_i32_0 = arith.constant 0 : i32
    %c0_i32_1 = arith.constant 0 : i32
    %c0_i32_2 = arith.constant 0 : i32
    return %c0_i32, %c0_i32_0, %c0_i32_1 : i32, i32, i32
  }
  func.func @transform_11(%arg0: i32) -> (i32, i32, i32) {
    %c0_i32 = arith.constant 0 : i32
    %c0_i32_0 = arith.constant 0 : i32
    %c0_i32_1 = arith.constant 0 : i32
    %c0_i32_2 = arith.constant 0 : i32
    return %c0_i32, %c0_i32_0, %c0_i32_1 : i32, i32, i32
  }
  func.func @transform_12(%arg0: i32) -> (i32, i32, i32) {
    %c0_i32 = arith.constant 0 : i32
    %c0_i32_0 = arith.constant 0 : i32
    %c0_i32_1 = arith.constant 0 : i32
    %c0_i32_2 = arith.constant 0 : i32
    return %c0_i32, %c0_i32_0, %c0_i32_1 : i32, i32, i32
  }
  func.func @transform_13(%arg0: i32) -> (i32, i32) {
    %c0_i32 = arith.constant 0 : i32
    %c0_i32_0 = arith.constant 0 : i32
    %c0_i32_1 = arith.constant 0 : i32
    return %c0_i32, %c0_i32_0 : i32, i32
  }
  func.func @transform_14(%arg0: i32) -> (i32, i32, i32) {
    %c0_i32 = arith.constant 0 : i32
    %c0_i32_0 = arith.constant 0 : i32
    %c0_i32_1 = arith.constant 0 : i32
    %c0_i32_2 = arith.constant 0 : i32
    return %c0_i32, %c0_i32_0, %c0_i32_1 : i32, i32, i32
  }
}

</mosaic_0001>

<bundles_post_ra>
// kernel: tile.24
= control target key start
LH: loop header
LB: loop body
LE: loop exit
PB: predicated region body
PF: predicated region fallthrough
CT: control target
= control target key end

     0   :  { %s276_s22 = smov 3  ;;  %vm82_vm0 = vcmask 523264   ;;  %s278_s23 = smov 3  ;;  %vm178_vm1 = vcmask 1047556   ;;  %vm182_vm2 = vcmask 1048064   ;;  %s387_s0 = inlined_call_operand.vmem [shape: f32[16,3,64], index: 0, kind: input, shape index: {}]   ;;  %s388_s1 = inlined_call_operand.vmem [shape: f32[16,192], index: 1, kind: output, shape index: {}]  }
   0x1   :  { %v217_v0 = vld [vmem:[%s387_s0 + $0x1c] sm:$0xf]  ;;  %v218_v1 = vld [vmem:[%s387_s0 + $0x18] sm:$0xf]  ;;  %v219_v2 = vld [vmem:[%s387_s0 + $0x14] sm:$0xf] }
   0x2   :  { %48 = vst [vmem:[#allocation0 + $0x38] sm:$0xf] %v217_v0  ;;  %53 = vst [vmem:[#allocation0 + $0x30] sm:$0xf] %v218_v1  ;;  %v220_v3 = vld [vmem:[%s387_s0 + $0x10] sm:$0xf] }
   0x3   :  { %58 = vst [vmem:[#allocation0 + $0x28] sm:$0xf] %v219_v2  ;;  %v221_v4 = vld [vmem:[%s387_s0 + $0xc] sm:$0xf]  ;;  %v222_v5 = vld [vmem:[%s387_s0 + $0x8] sm:$0xf] }
   0x4   :  { %63 = vst [vmem:[#allocation0 + $0x20] sm:$0xf] %v220_v3  ;;  %68 = vst [vmem:[#allocation0 + $0x18] sm:$0xf] %v221_v4  ;;  %v223_v6 = vld [vmem:[%s387_s0 + $0x4] sm:$0xf] }
   0x5   :  { %73 = vst [vmem:[#allocation0 + $0x10] sm:$0xf] %v222_v5  ;;  %v78_v7 = vld [vmem:[%s387_s0] sm:$0xf]  ;;  %77 = vst [vmem:[#allocation0 + $0x8] sm:$0xf] %v223_v6 }
   0x6   :  { %79 = vst [vmem:[#allocation0] sm:$0xf] %v78_v7  ;;  %s91_s24 = smov 3  ;;  %v216_v8 = vld [vmem:[%s387_s0 + $0x20] sm:$0xf]  ;;  %s97_s27 = smov 3 }
   0x7   :  { %s103_s28 = smov 3  ;;  %43 = vst [vmem:[#allocation0 + $0x40] sm:$0xf] %v216_v8  ;;  %v209_v9 = vld [vmem:[%s387_s0 + $0x3c] sm:$0xf]  ;;  %s109_s4 = smov 3 }
   0x8   :  { %v210_v10 = vld [vmem:[%s387_s0 + $0x38] sm:$0xf]  ;;  %s115_s5 = smov 3  ;;  %8 = vst [vmem:[#allocation0 + $0x78] sm:$0xf] %v209_v9  ;;  %s295_s10 = smov 3 }
   0x9   :  { %13 = vst [vmem:[#allocation0 + $0x70] sm:$0xf] %v210_v10  ;;  %v211_v11 = vld [vmem:[%s387_s0 + $0x34] sm:$0xf]  ;;  %v212_v12 = vld [vmem:[%s387_s0 + $0x30] sm:$0xf] }
   0xa   :  { %18 = vst [vmem:[#allocation0 + $0x68] sm:$0xf] %v211_v11  ;;  %23 = vst [vmem:[#allocation0 + $0x60] sm:$0xf] %v212_v12  ;;  %v213_v13 = vld [vmem:[%s387_s0 + $0x2c] sm:$0xf] }
   0xb   :  { %v214_v14 = vld [vmem:[%s387_s0 + $0x28] sm:$0xf]  ;;  %28 = vst [vmem:[#allocation0 + $0x58] sm:$0xf] %v213_v13  ;;  %v215_v15 = vld [vmem:[%s387_s0 + $0x24] sm:$0xf] }
   0xc   :  { %33 = vst [vmem:[#allocation0 + $0x50] sm:$0xf] %v214_v14  ;;  %s306_s0 = smov 3  ;;  %s308_s17 = smov 3  ;;  %v110_v16 = vld [vmem:[#allocation0 + $0x28] ss:$2 sm:%s109_s4]  }
   0xd   :  { %v116_v17 = vld [vmem:[#allocation0 + $0x30] ss:$2 sm:%s115_s5]   ;;  %38 = vst [vmem:[#allocation0 + $0x48] sm:$0xf] %v215_v15  ;;  %s139_s18 = smov 3  ;;  %s145_s19 = smov 3 }
   0xe   :  { %v92_v18 = vld [vmem:[#allocation0 + $0x10] ss:$2 sm:%s91_s24]   ;;  %v104_v20 = vld [vmem:[#allocation0 + $0x20] ss:$2 sm:%s103_s28]   ;;  %s151_s30 = smov 3  ;;  %s157_s2 = smov 3 }
   0xf   :  { %v98_v19 = vld [vmem:[#allocation0 + $0x18] ss:$2 sm:%s97_s27]   ;;  %228 = vst.msk [vmem:[%s388_s1 + $0x5] ss:$8 sm:$0x3] %vm82_vm0, %v110_v16   ;;  %s163_s7 = smov 3 }
  0x10   :  { %229 = vst.msk [vmem:[%s388_s1 + $0x6] ss:$8 sm:$0x3] %vm82_vm0, %v116_v17   ;;  %v81_v21 = vld [vmem:[#allocation0] ss:$2 sm:%s276_s22]   ;;  %s169_s8 = smov 3 }
  0x11   :  { %v86_v22 = vld [vmem:[#allocation0 + $0x8] ss:$2 sm:%s278_s23]   ;;  %225 = vst.msk [vmem:[%s388_s1 + $0x2] ss:$8 sm:$0x3] %vm82_vm0, %v92_v18   ;;  %s241_s9 = smov 64  }
  0x12   :  { %226 = vst.msk [vmem:[%s388_s1 + $0x3] ss:$8 sm:$0x3] %vm82_vm0, %v98_v19   ;;  %227 = vst.msk [vmem:[%s388_s1 + $0x4] ss:$8 sm:$0x3] %vm82_vm0, %v104_v20  }
  0x13   :  { %83 = vst.msk [vmem:[%s388_s1] ss:$8 sm:$0x3] %vm82_vm0, %v81_v21   ;;  %224 = vst.msk [vmem:[%s388_s1 + $0x1] ss:$8 sm:$0x3] %vm82_vm0, %v86_v22  }
  0x14   :  { %v175_v23 = vld [vmem:[#allocation0 + $0x1] ss:$8 sm:$0xf]   ;;  %v122_v26 = vld [vmem:[#allocation0 + $0x38] ss:$2 sm:%s295_s10]  }
  0x15   :  { %v177_v24 = vld [vmem:[#allocation0 + $0x1] ss:$8 sm:$0xf0]   ;;  %230 = vst.msk [vmem:[%s388_s1 + $0x7] ss:$8 sm:$0x3] %vm82_vm0, %v122_v26  }
  0x16   :  { %v179_v25 = vsel %vm178_vm1, %v177_v24, %v175_v23  ;;  %v152_v27 = vld [vmem:[#allocation0 + $0x60] ss:$2 sm:%s151_s30]   ;;  %v164_v29 = vld [vmem:[#allocation0 + $0x70] ss:$2 sm:%s163_s7]  }
  0x17   :  { %180 = vrot.lane.b32.xlu0 %v179_v25, %s241_s9  ;;  %v158_v28 = vld [vmem:[#allocation0 + $0x68] ss:$2 sm:%s157_s2]   ;;  %v146_v31 = vld [vmem:[#allocation0 + $0x58] ss:$2 sm:%s145_s19]  }
  0x18   :  { %v140_v30 = vld [vmem:[#allocation0 + $0x50] ss:$2 sm:%s139_s18]   ;;  %235 = vst.msk [vmem:[%s388_s1 + $0x14] ss:$8 sm:$0x3] %vm82_vm0, %v152_v27  }
  0x19   :  { %236 = vst.msk [vmem:[%s388_s1 + $0x15] ss:$8 sm:$0x3] %vm82_vm0, %v158_v28   ;;  %237 = vst.msk [vmem:[%s388_s1 + $0x16] ss:$8 sm:$0x3] %vm82_vm0, %v164_v29  }
  0x1a   :  { %v170_v32 = vld [vmem:[#allocation0 + $0x78] ss:$2 sm:%s169_s8]   ;;  %v134_v34 = vld [vmem:[#allocation0 + $0x48] ss:$2 sm:%s308_s17]  }
  0x1b   :  { %v128_v33 = vld [vmem:[#allocation0 + $0x40] ss:$2 sm:%s306_s0]   ;;  %233 = vst.msk [vmem:[%s388_s1 + $0x12] ss:$8 sm:$0x3] %vm82_vm0, %v140_v30  }
  0x1c   :  { %234 = vst.msk [vmem:[%s388_s1 + $0x13] ss:$8 sm:$0x3] %vm82_vm0, %v146_v31   ;;  %238 = vst.msk [vmem:[%s388_s1 + $0x17] ss:$8 sm:$0x3] %vm82_vm0, %v170_v32  }
  0x1d   :  { %231 = vst.msk [vmem:[%s388_s1 + $0x10] ss:$8 sm:$0x3] %vm82_vm0, %v128_v33   ;;  %232 = vst.msk [vmem:[%s388_s1 + $0x11] ss:$8 sm:$0x3] %vm82_vm0, %v134_v34  }
  0x1e   :  { %v185_v35 = vld [vmem:[#allocation0 + $0x41] ss:$8 sm:$0xf]  }
  0x1f   :  { %v187_v36 = vld [vmem:[#allocation0 + $0x41] ss:$8 sm:$0xf0]  }
  0x20   :  { %v189_v37 = vsel %vm178_vm1, %v187_v36, %v185_v35 }
  0x21   :  { %190 = vrot.lane.b32.xlu0 %v189_v37, %s241_s9 }
  0x89   :  { %v181_v38 = vpop.permute.xlu0 %180  }
  0x8a   :  { %183 = vst.msk [vmem:[%s388_s1] sm:$0xff] %vm182_vm2, %v181_v38  }
  0x93   :  { %v191_v39 = vpop.permute.xlu0 %190  }
  0x94   :  { %239 = vst.msk [vmem:[%s388_s1 + $0x10] sm:$0xff] %vm182_vm2, %v191_v39  }

// kernel: chatglm_encode.1
= control target key start
LH: loop header
LB: loop body
LE: loop exit
PB: predicated region body
PF: predicated region fallthrough
CT: control target
= control target key end

     0   :  { %v2796_v34 = vmov 0   ;;  %v2797_v51 = vmov 0.0   ;;  %v103_v52 = vlaneseq  ;;  %vm2798_vm0 = vmmov 0   ;;  %s3590_s0 = inlined_call_operand.vmem [shape: f32[16,128], index: 0, kind: input, shape index: {}]   ;;  %s3591_s5 = inlined_call_operand.vmem [shape: bf16[2,128,256], index: 5, kind: input, shape index: {}]   ;;  %s3592_s7 = inlined_call_operand.vmem [shape: bf16[2,128,256], index: 7, kind: input, shape index: {}]   ;;  %s3593_s14 = inlined_call_operand.vmem [shape: f32[3,16,128], index: 14, kind: output, shape index: {}]   ;;  %s3594_s4 = inlined_call_operand.vmem [shape: f32[2,1,128], index: 4, kind: input, shape index: {}]   ;;  %s3595_s6 = inlined_call_operand.vmem [shape: f32[2,1,256], index: 6, kind: input, shape index: {}]   ;;  %s3596_s8 = inlined_call_operand.vmem [shape: f32[2,1,256], index: 8, kind: input, shape index: {}]   ;;  %s3597_s2 = inlined_call_operand.vmem [shape: f32[16,256], index: 2, kind: input, shape index: {}]   ;;  %s3598_s3 = inlined_call_operand.vmem [shape: f32[16,256], index: 3, kind: input, shape index: {}]   ;;  %s3599_s1 = inlined_call_operand.vmem [shape: f32[2,16,8], index: 1, kind: input, shape index: {}]   ;;  %s3600_s9 = inlined_call_operand.vmem [shape: bf16[2,128,128], index: 9, kind: input, shape index: {}]   ;;  %s3601_s11 = inlined_call_operand.vmem [shape: bf16[2,128,256], index: 11, kind: input, shape index: {}]   ;;  %s3602_s10 = inlined_call_operand.vmem [shape: f32[2,1,128], index: 10, kind: input, shape index: {}]   ;;  %s3603_s12 = inlined_call_operand.vmem [shape: bf16[2,128,128], index: 12, kind: input, shape index: {}]   ;;  %s3604_s13 = inlined_call_operand.vmem [shape: f32[1,128], index: 13, kind: input, shape index: {}]  }
   0x1   :  { %v2878_v0 = vld [vmem:[%s3590_s0] sm:$0xff]  ;;  %v2883_v1 = vld [vmem:[%s3590_s0 + $0x8] sm:$0xff]  ;;  %v2558_v8 = vld [vmem:[%s3591_s5 + $0x14] ss:$8 sps:$4 sm:$0xff]   ;;  %225 = vmatprep.mubr.bf16.mxu0 %v2796_v34  ;;  %376 = vmatprep.mubr.bf16.mxu1 %v2796_v34  ;;  %vm405_vm1 = vcmask 523264   ;;  %vm459_vm2 = vcmask 64512  }
   0x2   :  { %v61_v2 = vmul.f32 %v2878_v0, %v2878_v0  ;;  %58 = vst [vmem:[%s3593_s14] sm:$0xff] %v2878_v0  ;;  %59 = vst [vmem:[%s3593_s14 + $0x8] sm:$0xff] %v2883_v1  ;;  %v2552_v3 = vld [vmem:[%s3591_s5 + $0x4] ss:$8 sps:$4 sm:$0xff]   ;;  %v2556_v5 = vld [vmem:[%s3591_s5] ss:$8 sps:$4 sm:$0xff]   ;;  %v62_v6 = vmul.f32 %v2883_v1, %v2883_v1  ;;  %v104_v53 = vshrl.u32 %v103_v52, 7 }
   0x3   :  { %v2554_v4 = vld [vmem:[%s3592_s7 + $0x4] ss:$8 sps:$4 sm:$0xff]   ;;  %193 = vmatprep.subr.bf16.mxu0 %v2552_v3  ;;  %v2557_v7 = vld [vmem:[%s3592_s7] ss:$8 sps:$4 sm:$0xff]   ;;  %v2560_v9 = vld [vmem:[%s3592_s7 + $0x14] ss:$8 sps:$4 sm:$0xff]  }
   0x4   :  { %63 = vadd.xlane.f32.xlu0 %v61_v2  ;;  %344 = vmatprep.subr.bf16.mxu1 %v2554_v4  ;;  %v2562_v10 = vld [vmem:[%s3591_s5 + $0x10] ss:$8 sps:$4 sm:$0xff]   ;;  %v2564_v12 = vld [vmem:[%s3591_s5 + $0x24] ss:$8 sps:$4 sm:$0xff]   ;;  %v2568_v14 = vld [vmem:[%s3591_s5 + $0x20] ss:$8 sps:$4 sm:$0xff]  }
   0x5   :  { %194 = vmatpush1.bf16.msra.mxu0 %v2556_v5  ;;  %345 = vmatpush1.bf16.msra.mxu1 %v2557_v7  ;;  %v2563_v11 = vld [vmem:[%s3592_s7 + $0x10] ss:$8 sps:$4 sm:$0xff]   ;;  %v2566_v13 = vld [vmem:[%s3592_s7 + $0x24] ss:$8 sps:$4 sm:$0xff]   ;;  %v2569_v15 = vld [vmem:[%s3592_s7 + $0x20] ss:$8 sps:$4 sm:$0xff]  }
   0x6   :  { %195 = vmatprep.subr.bf16.mxu0 %v2558_v8  ;;  %346 = vmatprep.subr.bf16.mxu1 %v2560_v9  ;;  %v2570_v16 = vld [vmem:[%s3591_s5 + $0x34] ss:$8 sps:$4 sm:$0xff]   ;;  %v2574_v18 = vld [vmem:[%s3591_s5 + $0x30] ss:$8 sps:$4 sm:$0xff]   ;;  %v2576_v20 = vld [vmem:[%s3591_s5 + $0x44] ss:$8 sps:$4 sm:$0xff]  }
   0x7   :  { %v2572_v17 = vld [vmem:[%s3592_s7 + $0x34] ss:$8 sps:$4 sm:$0xff]   ;;  %v2575_v19 = vld [vmem:[%s3592_s7 + $0x30] ss:$8 sps:$4 sm:$0xff]   ;;  %v2578_v21 = vld [vmem:[%s3592_s7 + $0x44] ss:$8 sps:$4 sm:$0xff]  }
   0x8   :  { %65 = vadd.xlane.f32.xlu0 %v62_v6  ;;  %v2580_v22 = vld [vmem:[%s3591_s5 + $0x40] ss:$8 sps:$4 sm:$0xff]   ;;  %v2582_v24 = vld [vmem:[%s3591_s5 + $0x54] ss:$8 sps:$4 sm:$0xff]   ;;  %v2586_v26 = vld [vmem:[%s3591_s5 + $0x50] ss:$8 sps:$4 sm:$0xff]  }
   0x9   :  { %196 = vmatpush1.bf16.msra.mxu0 %v2562_v10  ;;  %347 = vmatpush1.bf16.msra.mxu1 %v2563_v11  ;;  %v2581_v23 = vld [vmem:[%s3592_s7 + $0x40] ss:$8 sps:$4 sm:$0xff]   ;;  %v2584_v25 = vld [vmem:[%s3592_s7 + $0x54] ss:$8 sps:$4 sm:$0xff]   ;;  %v2587_v27 = vld [vmem:[%s3592_s7 + $0x50] ss:$8 sps:$4 sm:$0xff]  }
   0xa   :  { %197 = vmatprep.subr.bf16.mxu0 %v2564_v12  ;;  %348 = vmatprep.subr.bf16.mxu1 %v2566_v13  ;;  %v2588_v28 = vld [vmem:[%s3591_s5 + $0x64] ss:$8 sps:$4 sm:$0xff]   ;;  %v2592_v30 = vld [vmem:[%s3591_s5 + $0x60] ss:$8 sps:$4 sm:$0xff]   ;;  %v2594_v32 = vld [vmem:[%s3591_s5 + $0x74] ss:$8 sps:$4 sm:$0xff]  }
   0xb   :  { %v2590_v29 = vld [vmem:[%s3592_s7 + $0x64] ss:$8 sps:$4 sm:$0xff]   ;;  %v2593_v31 = vld [vmem:[%s3592_s7 + $0x60] ss:$8 sps:$4 sm:$0xff]   ;;  %v2596_v33 = vld [vmem:[%s3592_s7 + $0x74] ss:$8 sps:$4 sm:$0xff]  }
   0xc   :  { %v2598_v35 = vld [vmem:[%s3591_s5 + $0x70] ss:$8 sps:$4 sm:$0xff]   ;;  %v2121_v46 = vld [vmem:[%s3594_s4] ss:$0 sm:$0xff]  ;;  %v3002_v54 = vsub.s32 0, %v104_v53  ;;  %v3010_v57 = vsub.s32 1, %v104_v53 }
   0xd   :  { %198 = vmatpush1.bf16.msra.mxu0 %v2568_v14  ;;  %349 = vmatpush1.bf16.msra.mxu1 %v2569_v15  ;;  %v2599_v36 = vld [vmem:[%s3592_s7 + $0x70] ss:$8 sps:$4 sm:$0xff]   ;;  %v101_v55 = vld [vmem:[%s3595_s6] sm:$0x3]  ;;  %v3033_v6 = vld [vmem:[%s3597_s2 + $0x8] sm:$0xff]  ;;  %vm489_vm3 = vcmask 1043456  }
   0xe   :  { %199 = vmatprep.subr.bf16.mxu0 %v2570_v16  ;;  %350 = vmatprep.subr.bf16.mxu1 %v2572_v17  ;;  %v252_v56 = vld [vmem:[%s3596_s8] sm:$0x3]  ;;  %v106_v58 = vrot.slane %v101_v55, %v3002_v54  ;;  %v110_v60 = vrot.slane %v101_v55, %v3010_v57  ;;  %v3038_v8 = vld [vmem:[%s3598_s3 + $0x8] sm:$0xff]  ;;  %v3043_v12 = vld [vmem:[%s3597_s2 + $0x10] sm:$0xff] }
   0xf   :  { %v257_v59 = vrot.slane %v252_v56, %v3002_v54  ;;  %v261_v61 = vrot.slane %v252_v56, %v3010_v57  ;;  %v3023_v62 = vld [vmem:[%s3597_s2] sm:$0xff]  ;;  %v3048_v14 = vld [vmem:[%s3598_s3 + $0x10] sm:$0xff] }
  0x10   :  { %v3028_v2 = vld [vmem:[%s3598_s3] sm:$0xff] }
  0x11   :  { %200 = vmatpush1.bf16.msra.mxu0 %v2574_v18  ;;  %351 = vmatpush1.bf16.msra.mxu1 %v2575_v19 }
  0x12   :  { %201 = vmatprep.subr.bf16.mxu0 %v2576_v20  ;;  %352 = vmatprep.subr.bf16.mxu1 %v2578_v21  ;;  %v3055_v20 = vld [vmem:[%s3597_s2 + $0x18] sm:$0xff]  ;;  %s2799_s2 = smov 64  }
  0x15   :  { %202 = vmatpush1.bf16.msra.mxu0 %v2580_v22  ;;  %353 = vmatpush1.bf16.msra.mxu1 %v2581_v23  ;;  %v3060_v22 = vld [vmem:[%s3598_s3 + $0x18] sm:$0xff] }
  0x16   :  { %203 = vmatprep.subr.bf16.mxu0 %v2582_v24  ;;  %354 = vmatprep.subr.bf16.mxu1 %v2584_v25 }
  0x19   :  { %204 = vmatpush1.bf16.msra.mxu0 %v2586_v26  ;;  %355 = vmatpush1.bf16.msra.mxu1 %v2587_v27 }
  0x1a   :  { %205 = vmatprep.subr.bf16.mxu0 %v2588_v28  ;;  %356 = vmatprep.subr.bf16.mxu1 %v2590_v29 }
  0x1d   :  { %206 = vmatpush1.bf16.msra.mxu0 %v2592_v30  ;;  %357 = vmatpush1.bf16.msra.mxu1 %v2593_v31 }
  0x1e   :  { %207 = vmatprep.subr.bf16.mxu0 %v2594_v32  ;;  %358 = vmatprep.subr.bf16.mxu1 %v2596_v33 }
  0x21   :  { %208 = vmatpush1.bf16.msra.mxu0 %v2598_v35  ;;  %359 = vmatpush1.bf16.msra.mxu1 %v2599_v36 }
  0x22   :  { %2410 = vmatprep.subr.bf16.mxu1 %v2797_v51  ;;  %2434 = vmatprep.subr.bf16.mxu0 %v2797_v51 }
  0x91   :  { %v64_v37 = vpop.xlane.xlu0 %63 }
  0x92   :  { %v68_v38 = vmul.f32 0.0078125, %v64_v37 }
  0x94   :  { %v70_v39 = vadd.f32 1e-05, %v68_v38 }
  0x95   :  { %v66_v40 = vpop.xlane.xlu0 %65 }
  0x96   :  { %2728 = vrsqrt.f32 %v70_v39  ;;  %v69_v41 = vmul.f32 0.0078125, %v66_v40 }
  0x98   :  { %v71_v42 = vadd.f32 1e-05, %v69_v41 }
  0x9a   :  { %2730 = vrsqrt.f32 %v71_v42  ;;  %v3079_v42 = vld [vmem:[%s3599_s1] sm:$0xff] }
  0xa0   :  { %v2729_v43 = vpop.eup %2728 }
  0xa1   :  { %v74_v44 = vmul.f32 %v2729_v43, %v2878_v0 }
  0xa3   :  { %v82_v48 = vmul.f32 %v2121_v46, %v74_v44 }
  0xa4   :  { %v2731_v45 = vpop.eup %2730 }
  0xa5   :  { %v75_v47 = vmul.f32 %v2731_v45, %v2883_v1 }
  0xa7   :  { %v83_v49 = vmul.f32 %v2121_v46, %v75_v47  ;;  %v3084_v46 = vld [vmem:[%s3599_s1 + $0x8] sm:$0xff] }
  0xa9   :  { %v100_v50 = vpack.c.bf16 %v83_v49, %v82_v48 }
  0xab   :  { %226 = vmatmul.mubr.bf16.vlgmr.msra.gmra.mrb[0].mxu0 %v100_v50  ;;  %377 = vmatmul.mubr.bf16.vlgmr.msra.gmra.mrb[0].mxu1 %v100_v50 }
  0xac   :  { %2412 = vmatprep.mubr.msk.bf16.mxu1 %vm2798_vm0, %v2797_v51  ;;  %2450 = vmatprep.mubr.msk.bf16.mxu0 %vm2798_vm0, %v2797_v51 }
 0x17e   :  { %v227_v63 = vpop.f32.mrb[0].mxu0  ;;  %v378_v3 = vpop.f32.mrb[0].mxu1 }
 0x17f   :  { %v228_v4 = vadd.f32 %v227_v63, %v106_v58  ;;  %v379_v5 = vadd.f32 %v378_v3, %v257_v59  ;;  %v229_v7 = vpop.f32.mrb[1].mxu0  ;;  %v380_v9 = vpop.f32.mrb[1].mxu1 }
 0x180   :  { %v230_v10 = vadd.f32 %v229_v7, %v110_v60  ;;  %v381_v11 = vadd.f32 %v380_v9, %v261_v61  ;;  %v231_v13 = vpop.f32.mrb[2].mxu0  ;;  %v382_v15 = vpop.f32.mrb[2].mxu1 }
 0x181   :  { %v387_v16 = vmul.f32 %v228_v4, %v3023_v62  ;;  %v391_v17 = vmul.f32 %v379_v5, %v3028_v2  ;;  %v232_v18 = vadd.f32 %v231_v13, %v106_v58  ;;  %v383_v19 = vadd.f32 %v382_v15, %v257_v59  ;;  %v233_v21 = vpop.f32.mrb[3].mxu0  ;;  %v384_v23 = vpop.f32.mrb[3].mxu1 }
 0x182   :  { %v388_v24 = vmul.f32 %v230_v10, %v3033_v6  ;;  %v392_v25 = vmul.f32 %v381_v11, %v3038_v8  ;;  %v234_v26 = vadd.f32 %v233_v21, %v110_v60  ;;  %v385_v27 = vadd.f32 %v384_v23, %v261_v61 }
 0x183   :  { %v389_v28 = vmul.f32 %v232_v18, %v3043_v12  ;;  %v393_v29 = vmul.f32 %v383_v19, %v3048_v14  ;;  %v395_v30 = vadd.f32 %v391_v17, %v387_v16 }
 0x184   :  { %v396_v31 = vadd.f32 %v392_v25, %v388_v24  ;;  %v390_v32 = vmul.f32 %v234_v26, %v3055_v20  ;;  %v394_v33 = vmul.f32 %v385_v27, %v3060_v22 }
 0x185   :  { %401 = vrot.lane.b32.xlu1 %v395_v30, %s2799_s2  ;;  %v3069_v35 = vadd.f32 %v393_v29, %v389_v28 }
 0x186   :  { %v399_v36 = vpack.c.bf16 %v396_v31, %v396_v31  ;;  %v398_v37 = vadd.f32 %v394_v33, %v390_v32 }
 0x188   :  { %v410_v38 = vsel %vm405_vm1, %v399_v36, 0  ;;  %v539_v16 = vpack.c.bf16 %v398_v37, %v398_v37 }
 0x189   :  { %2411 = vmatpush3.bf16.xpose.msra.mxu1 %v410_v38 }
 0x18a   :  { %2416 = vmatprep.subr.bf16.mxu1 %v2797_v51  ;;  %v549_v21 = vsel %vm405_vm1, %v539_v16, 0 }
 0x1f7   :  { %v402_v39 = vpop.permute.xlu1 %401 }
 0x1f8   :  { %v404_v40 = vpack.c.bf16 %v402_v39, %v395_v30  ;;  %v3113_v30 = vld [vmem:[%s3599_s1 + $0x10] sm:$0xff] }
 0x1fa   :  { %2413 = vmatmul.mubr.msk.bf16.vlgmr.msra.gmra.mrb[4].mxu1 %vm405_vm1, %v404_v40 }
 0x1fb   :  { %2418 = vmatprep.mubr.msk.bf16.mxu1 %vm2798_vm0, %v2797_v51 }
 0x2cd   :  { %v446_v41 = vpop.f32.mrb[4].mxu1 }
 0x2ce   :  { %v453_v43 = vmul.f32 0.125, %v446_v41  ;;  %v2414_v44 = vpop.f32.mrb[5].mxu1 }
 0x2cf   :  { %v449_v45 = vpop.f32.mrb[6].mxu1 }
 0x2d0   :  { %v454_v47 = vmul.f32 0.125, %v449_v45  ;;  %v2415_v48 = vpop.f32.mrb[7].mxu1  ;;  %v457_v49 = vadd.f32 %v3079_v42, %v453_v43 }
 0x2d2   :  { %v460_v50 = vsel %vm459_vm2, %v457_v49, -inf  ;;  %v458_v52 = vadd.f32 %v3084_v46, %v454_v47 }
 0x2d3   :  { %461 = vmax.xlane.f32.xlu1 %v460_v50 }
 0x2d4   :  { %v463_v53 = vsel %vm459_vm2, %v458_v52, -inf }
 0x2d5   :  { %464 = vmax.xlane.f32.xlu0 %v463_v53 }
 0x2e4   :  { %541 = vrot.lane.b32.xlu1 %v3069_v35, %s2799_s2 }
 0x360   :  { %v462_v55 = vpop.xlane.xlu1 %461 }
 0x361   :  { %v466_v56 = vsub.f32 %v457_v49, %v462_v55 }
 0x362   :  { %v465_v58 = vpop.xlane.xlu0 %464 }
 0x363   :  { %v468_v59 = vmul.f32 1.442695, %v466_v56  ;;  %v467_v60 = vsub.f32 %v458_v52, %v465_v58 }
 0x364   :  { %v542_v23 = vpop.permute.xlu1 %541 }
 0x365   :  { %2732 = vpow2.f32 %v468_v59  ;;  %v470_v61 = vmul.f32 1.442695, %v467_v60  ;;  %v544_v24 = vpack.c.bf16 %v542_v23, %v3069_v35  ;;  %v3118_v35 = vld [vmem:[%s3599_s1 + $0x18] sm:$0xff] }
 0x367   :  { %2734 = vpow2.f32 %v470_v61 }
 0x36f   :  { %v2733_v63 = vpop.eup %2732 }
 0x370   :  { %v472_v3 = vsel %vm459_vm2, %v2733_v63, 0.0 }
 0x371   :  { %v2735_v4 = vpop.eup %2734  ;;  %473 = vadd.xlane.f32.xlu0 %v472_v3 }
 0x372   :  { %v475_v5 = vsel %vm459_vm2, %v2735_v4, 0.0 }
 0x375   :  { %476 = vadd.xlane.f32.xlu0 %v475_v5 }
 0x38b   :  { %484 = vrot.lane.b32.xlu0 %v399_v36, %s2799_s2 }
 0x3fe   :  { %v474_v7 = vpop.xlane.xlu0 %473 }
 0x3ff   :  { %2736 = vrcp.f32 %v474_v7  ;;  %v2600_v7 = vld [vmem:[%s3600_s9] sm:$0xff]  }
 0x400   :  { %2435 = vmatpush3.bf16.msra.mxu0 %v2600_v7 }
 0x401   :  { %2436 = vmatprep.subr.bf16.mxu0 %v2797_v51 }
 0x402   :  { %v477_v9 = vpop.xlane.xlu0 %476 }
 0x403   :  { %2738 = vrcp.f32 %v477_v9  ;;  %v2601_v9 = vld [vmem:[%s3600_s9 + $0x8] sm:$0xff]  }
 0x404   :  { %2437 = vmatpush3.bf16.msra.mxu0 %v2601_v9 }
 0x405   :  { %2438 = vmatprep.subr.bf16.mxu0 %v2797_v51 }
 0x406   :  { %v485_v10 = vpop.permute.xlu0 %484 }
 0x407   :  { %v491_v11 = vsel %vm489_vm3, %v485_v10, 0  ;;  %v2602_v10 = vld [vmem:[%s3600_s9 + $0x10] sm:$0xff]  }
 0x408   :  { %2417 = vmatpush3.bf16.msra.mxu1 %v491_v11  ;;  %v2603_v11 = vld [vmem:[%s3600_s9 + $0x18] sm:$0xff]   ;;  %2439 = vmatpush3.bf16.msra.mxu0 %v2602_v10 }
 0x409   :  { %2422 = vmatprep.subr.bf16.mxu1 %v2797_v51  ;;  %v2737_v13 = vpop.eup %2736  ;;  %2440 = vmatprep.subr.bf16.mxu0 %v2797_v51 }
 0x40a   :  { %v480_v17 = vmul.f32 %v2737_v13, %v2733_v63  ;;  %v2604_v13 = vld [vmem:[%s3600_s9 + $0x20] sm:$0xff]  }
 0x40c   :  { %2441 = vmatpush3.bf16.msra.mxu0 %v2603_v11 }
 0x40d   :  { %v2739_v15 = vpop.eup %2738  ;;  %2442 = vmatprep.subr.bf16.mxu0 %v2797_v51 }
 0x40e   :  { %v481_v18 = vmul.f32 %v2739_v15, %v2735_v4  ;;  %v2605_v15 = vld [vmem:[%s3600_s9 + $0x28] sm:$0xff]  }
 0x410   :  { %v482_v19 = vpack.c.bf16 %v481_v18, %v480_v17  ;;  %2443 = vmatpush3.bf16.msra.mxu0 %v2604_v13  ;;  %v2607_v17 = vld [vmem:[%s3600_s9 + $0x38] sm:$0xff]   ;;  %v2168_v13 = vld [vmem:[%s3602_s10] ss:$0 sm:$0xff] }
 0x411   :  { %2444 = vmatprep.subr.bf16.mxu0 %v2797_v51 }
 0x412   :  { %2419 = vmatmul.mubr.msk.bf16.vlgmr.msra.gmra.mrb[8].mxu1 %vm459_vm2, %v482_v19 }
 0x413   :  { %2423 = vmatpush3.bf16.xpose.msra.mxu1 %v549_v21  ;;  %2424 = vmatprep.mubr.msk.bf16.mxu1 %vm2798_vm0, %v2797_v51 }
 0x414   :  { %2428 = vmatprep.subr.bf16.mxu1 %v2797_v51  ;;  %2445 = vmatpush3.bf16.msra.mxu0 %v2605_v15 }
 0x415   :  { %2446 = vmatprep.subr.bf16.mxu0 %v2797_v51 }
 0x41a   :  { %2425 = vmatmul.mubr.msk.bf16.vlgmr.msra.gmra.mrb[12].mxu1 %vm405_vm1, %v544_v24 }
 0x41b   :  { %2430 = vmatprep.mubr.msk.bf16.mxu1 %vm2798_vm0, %v2797_v51 }
 0x4e5   :  { %v3106_v25 = vpop.f32.mrb[8].mxu1 }
 0x4e6   :  { %v2420_v26 = vpop.f32.mrb[9].mxu1 }
 0x4e7   :  { %v3108_v27 = vpop.f32.mrb[10].mxu1 }
 0x4e8   :  { %v2421_v28 = vpop.f32.mrb[11].mxu1 }
 0x4ed   :  { %v585_v29 = vpop.f32.mrb[12].mxu1 }
 0x4ee   :  { %v592_v31 = vmul.f32 0.125, %v585_v29  ;;  %v2426_v32 = vpop.f32.mrb[13].mxu1 }
 0x4ef   :  { %v588_v33 = vpop.f32.mrb[14].mxu1 }
 0x4f0   :  { %v593_v36 = vmul.f32 0.125, %v588_v33  ;;  %v2427_v37 = vpop.f32.mrb[15].mxu1  ;;  %v597_v38 = vadd.f32 %v3113_v30, %v592_v31 }
 0x4f1   :  { %v2613_v37 = vld [vmem:[%s3601_s11 + $0x14] ss:$8 sps:$4 sm:$0xff]  }
 0x4f2   :  { %v599_v39 = vsel %vm459_vm2, %v597_v38, -inf  ;;  %v598_v40 = vadd.f32 %v3118_v35, %v593_v36  ;;  %v2610_v36 = vld [vmem:[%s3601_s11 + $0x4] ss:$8 sps:$4 sm:$0xff]  }
 0x4f3   :  { %600 = vmax.xlane.f32.xlu0 %v599_v39  ;;  %v2614_v39 = vld [vmem:[%s3601_s11 + $0x20] ss:$8 sps:$4 sm:$0xff]  }
 0x4f4   :  { %v602_v41 = vsel %vm459_vm2, %v598_v40, -inf }
 0x4f5   :  { %603 = vmax.xlane.f32.xlu1 %v602_v41 }
 0x580   :  { %v601_v43 = vpop.xlane.xlu0 %600 }
 0x581   :  { %v605_v44 = vsub.f32 %v597_v38, %v601_v43  ;;  %v2616_v38 = vld [vmem:[%s3601_s11 + $0x24] ss:$8 sps:$4 sm:$0xff]  }
 0x582   :  { %v604_v45 = vpop.xlane.xlu1 %603 }
 0x583   :  { %v607_v47 = vmul.f32 1.442695, %v605_v44  ;;  %v606_v48 = vsub.f32 %v598_v40, %v604_v45 }
 0x585   :  { %2740 = vpow2.f32 %v607_v47  ;;  %v609_v49 = vmul.f32 1.442695, %v606_v48 }
 0x587   :  { %2742 = vpow2.f32 %v609_v49 }
 0x58f   :  { %v2741_v50 = vpop.eup %2740 }
 0x590   :  { %v611_v52 = vsel %vm459_vm2, %v2741_v50, 0.0 }
 0x591   :  { %v2743_v53 = vpop.eup %2742  ;;  %612 = vadd.xlane.f32.xlu0 %v611_v52  ;;  %v2622_v52 = vld [vmem:[%s3601_s11 + $0x44] ss:$8 sps:$4 sm:$0xff]  }
 0x592   :  { %v614_v55 = vsel %vm459_vm2, %v2743_v53, 0.0 }
 0x595   :  { %615 = vadd.xlane.f32.xlu0 %v614_v55  ;;  %v2623_v55 = vld [vmem:[%s3601_s11 + $0x50] ss:$8 sps:$4 sm:$0xff]  }
 0x5ab   :  { %623 = vrot.lane.b32.xlu0 %v539_v16, %s2799_s2  ;;  %v2606_v16 = vld [vmem:[%s3600_s9 + $0x30] sm:$0xff]  }
 0x5ac   :  { %2447 = vmatpush3.bf16.msra.mxu0 %v2606_v16 }
 0x5ad   :  { %2448 = vmatprep.subr.bf16.mxu0 %v2797_v51 }
 0x5b0   :  { %2449 = vmatpush3.bf16.msra.mxu0 %v2607_v17 }
 0x5b1   :  { %2454 = vmatprep.subr.bf16.mxu0 %v2797_v51 }
 0x61e   :  { %v613_v56 = vpop.xlane.xlu0 %612 }
 0x61f   :  { %2744 = vrcp.f32 %v613_v56  ;;  %v2628_v56 = vld [vmem:[%s3601_s11 + $0x64] ss:$8 sps:$4 sm:$0xff]  }
 0x622   :  { %v616_v58 = vpop.xlane.xlu0 %615 }
 0x623   :  { %2746 = vrcp.f32 %v616_v58  ;;  %v2626_v58 = vld [vmem:[%s3601_s11 + $0x60] ss:$8 sps:$4 sm:$0xff]  }
 0x626   :  { %v624_v59 = vpop.permute.xlu0 %623 }
 0x627   :  { %v629_v60 = vsel %vm489_vm3, %v624_v59, 0  ;;  %v2631_v59 = vld [vmem:[%s3601_s11 + $0x74] ss:$8 sps:$4 sm:$0xff]  }
 0x628   :  { %2429 = vmatpush3.bf16.msra.mxu1 %v629_v60  ;;  %v2629_v60 = vld [vmem:[%s3601_s11 + $0x70] ss:$8 sps:$4 sm:$0xff]  }
 0x629   :  { %v2745_v61 = vpop.eup %2744  ;;  %905 = vmatprep.subr.bf16.mxu1 %v2610_v36 }
 0x62a   :  { %v619_v3 = vmul.f32 %v2745_v61, %v2741_v50  ;;  %v2619_v50 = vld [vmem:[%s3601_s11 + $0x34] ss:$8 sps:$4 sm:$0xff]  }
 0x62d   :  { %v2747_v63 = vpop.eup %2746 }
 0x62e   :  { %v620_v4 = vmul.f32 %v2747_v63, %v2743_v53  ;;  %v2625_v53 = vld [vmem:[%s3601_s11 + $0x54] ss:$8 sps:$4 sm:$0xff]  }
 0x630   :  { %v621_v5 = vpack.c.bf16 %v620_v4, %v619_v3 }
 0x632   :  { %2431 = vmatmul.mubr.msk.bf16.vlgmr.msra.gmra.mrb[16].mxu1 %vm459_vm2, %v621_v5 }
 0x633   :  { %937 = vmatprep.mubr.bf16.mxu1 %v2796_v34 }
 0x705   :  { %v665_v18 = vpop.f32.mrb[16].mxu1 }
 0x706   :  { %v2432_v19 = vpop.f32.mrb[17].mxu1 }
 0x707   :  { %v668_v21 = vpop.f32.mrb[18].mxu1  ;;  %v2632_v19 = vld [vmem:[%s3603_s12] sm:$0xff]  }
 0x708   :  { %v2542_v23 = vpack.i.bf16 %v668_v21, %v3108_v27  ;;  %v2433_v24 = vpop.f32.mrb[19].mxu1  ;;  %v2608_v27 = vld [vmem:[%s3601_s11] ss:$8 sps:$4 sm:$0xff]  }
 0x709   :  { %906 = vmatpush1.bf16.msra.mxu1 %v2608_v27  ;;  %v2633_v21 = vld [vmem:[%s3603_s12 + $0x8] sm:$0xff]   ;;  %v2635_v24 = vld [vmem:[%s3603_s12 + $0x18] sm:$0xff]  }
 0x70a   :  { %2543 = vrot.lane.b32.xlu1 %v2542_v23, %s2799_s2  ;;  %907 = vmatprep.subr.bf16.mxu1 %v2613_v37  ;;  %v2634_v23 = vld [vmem:[%s3603_s12 + $0x10] sm:$0xff]  }
 0x77c   :  { %v2544_v26 = vpop.permute.xlu1 %2543 }
 0x77d   :  { %v2546_v28 = vunpack.i.h.bf16 %v2544_v26  ;;  %v2545_v29 = vunpack.i.l.bf16 %v2544_v26  ;;  %v2636_v26 = vld [vmem:[%s3603_s12 + $0x20] sm:$0xff]  }
 0x77f   :  { %v676_v31 = vsel %vm405_vm1, %v665_v18, %v2546_v28  ;;  %v538_v32 = vsel %vm405_vm1, %v3106_v25, %v2545_v29  ;;  %v2611_v25 = vld [vmem:[%s3601_s11 + $0x10] ss:$8 sps:$4 sm:$0xff]   ;;  %v2637_v28 = vld [vmem:[%s3603_s12 + $0x28] sm:$0xff]  }
 0x780   :  { %v693_v33 = vpack.c.bf16 %v676_v31, %v538_v32  ;;  %908 = vmatpush1.bf16.msra.mxu1 %v2611_v25  ;;  %v2638_v29 = vld [vmem:[%s3603_s12 + $0x30] sm:$0xff]   ;;  %v2639_v31 = vld [vmem:[%s3603_s12 + $0x38] sm:$0xff]  }
 0x781   :  { %909 = vmatprep.subr.bf16.mxu1 %v2616_v38 }
 0x782   :  { %2451 = vmatmul.mubr.bf16.vlgmr.msra.gmra.mrb[4].mxu0 %v693_v33 }
 0x783   :  { %2470 = vmatprep.mubr.msk.bf16.mxu0 %vm2798_vm0, %v2797_v51  ;;  %2455 = vmatpush3.bf16.msra.mxu0 %v2632_v19  ;;  %v2661_v19 = vld [vmem:[%s3592_s7 + $0xb0] ss:$8 sps:$4 sm:$0xff]  }
 0x784   :  { %910 = vmatpush1.bf16.msra.mxu1 %v2614_v39  ;;  %2456 = vmatprep.subr.bf16.mxu0 %v2797_v51 }
 0x785   :  { %911 = vmatprep.subr.bf16.mxu1 %v2619_v50 }
 0x787   :  { %2457 = vmatpush3.bf16.msra.mxu0 %v2633_v21  ;;  %v2664_v21 = vld [vmem:[%s3591_s5 + $0xc0] ss:$8 sps:$4 sm:$0xff]  }
 0x788   :  { %2458 = vmatprep.subr.bf16.mxu0 %v2797_v51 }
 0x78b   :  { %2459 = vmatpush3.bf16.msra.mxu0 %v2634_v23  ;;  %v2666_v23 = vld [vmem:[%s3591_s5 + $0xc4] ss:$8 sps:$4 sm:$0xff]  }
 0x78c   :  { %2460 = vmatprep.subr.bf16.mxu0 %v2797_v51 }
 0x78f   :  { %2461 = vmatpush3.bf16.msra.mxu0 %v2635_v24  ;;  %v2667_v24 = vld [vmem:[%s3592_s7 + $0xc0] ss:$8 sps:$4 sm:$0xff]  }
 0x790   :  { %2462 = vmatprep.subr.bf16.mxu0 %v2797_v51 }
 0x793   :  { %2463 = vmatpush3.bf16.msra.mxu0 %v2636_v26  ;;  %v2669_v26 = vld [vmem:[%s3592_s7 + $0xc4] ss:$8 sps:$4 sm:$0xff]  }
 0x794   :  { %2464 = vmatprep.subr.bf16.mxu0 %v2797_v51 }
 0x797   :  { %2465 = vmatpush3.bf16.msra.mxu0 %v2637_v28  ;;  %v2672_v28 = vld [vmem:[%s3591_s5 + $0xd4] ss:$8 sps:$4 sm:$0xff]  }
 0x798   :  { %2466 = vmatprep.subr.bf16.mxu0 %v2797_v51 }
 0x79b   :  { %2467 = vmatpush3.bf16.msra.mxu0 %v2638_v29  ;;  %v2675_v29 = vld [vmem:[%s3592_s7 + $0xd4] ss:$8 sps:$4 sm:$0xff]  }
 0x79c   :  { %2468 = vmatprep.subr.bf16.mxu0 %v2797_v51 }
 0x79f   :  { %2469 = vmatpush3.bf16.msra.mxu0 %v2639_v31  ;;  %v2670_v31 = vld [vmem:[%s3591_s5 + $0xd0] ss:$8 sps:$4 sm:$0xff]  }
 0x855   :  { %v776_v40 = vpop.f32.mrb[4].mxu0 }
 0x856   :  { %v3188_v41 = vadd.f32 %v776_v40, %v2878_v0  ;;  %v2452_v43 = vpop.f32.mrb[5].mxu0  ;;  %v2617_v0 = vld [vmem:[%s3601_s11 + $0x30] ss:$8 sps:$4 sm:$0xff]  }
 0x857   :  { %v779_v44 = vpop.f32.mrb[6].mxu0  ;;  %912 = vmatpush1.bf16.msra.mxu1 %v2617_v0 }
 0x858   :  { %v3191_v45 = vadd.f32 %v779_v44, %v2883_v1  ;;  %v2453_v47 = vpop.f32.mrb[7].mxu0  ;;  %v786_v48 = vmul.f32 %v3188_v41, %v3188_v41  ;;  %v2620_v1 = vld [vmem:[%s3601_s11 + $0x40] ss:$8 sps:$4 sm:$0xff]   ;;  %913 = vmatprep.subr.bf16.mxu1 %v2622_v52 }
 0x859   :  { %v2640_v52 = vld [vmem:[%s3591_s5 + $0x80] ss:$8 sps:$4 sm:$0xff]  }
 0x85a   :  { %788 = vadd.xlane.f32.xlu0 %v786_v48  ;;  %v787_v49 = vmul.f32 %v3191_v45, %v3191_v45 }
 0x85b   :  { %914 = vmatpush1.bf16.msra.mxu1 %v2620_v1 }
 0x85c   :  { %790 = vadd.xlane.f32.xlu1 %v787_v49  ;;  %915 = vmatprep.subr.bf16.mxu1 %v2625_v53  ;;  %v2642_v53 = vld [vmem:[%s3591_s5 + $0x84] ss:$8 sps:$4 sm:$0xff]  }
 0x85f   :  { %916 = vmatpush1.bf16.msra.mxu1 %v2623_v55  ;;  %v2643_v55 = vld [vmem:[%s3592_s7 + $0x80] ss:$8 sps:$4 sm:$0xff]  }
 0x860   :  { %917 = vmatprep.subr.bf16.mxu1 %v2628_v56  ;;  %v2645_v56 = vld [vmem:[%s3592_s7 + $0x84] ss:$8 sps:$4 sm:$0xff]  }
 0x861   :  { %1363 = vmatprep.subr.bf16.mxu0 %v2645_v56 }
 0x863   :  { %918 = vmatpush1.bf16.msra.mxu1 %v2626_v58  ;;  %v2648_v58 = vld [vmem:[%s3591_s5 + $0x94] ss:$8 sps:$4 sm:$0xff]  }
 0x864   :  { %919 = vmatprep.subr.bf16.mxu1 %v2631_v59  ;;  %v2651_v59 = vld [vmem:[%s3592_s7 + $0x94] ss:$8 sps:$4 sm:$0xff]  }
 0x867   :  { %920 = vmatpush1.bf16.msra.mxu1 %v2629_v60  ;;  %v2646_v60 = vld [vmem:[%s3591_s5 + $0x90] ss:$8 sps:$4 sm:$0xff]  }
 0x868   :  { %1210 = vmatprep.subr.bf16.mxu1 %v2642_v53  ;;  %v2198_v53 = vld [vmem:[%s3594_s4 + $0x1] ss:$0 sm:$0xff] }
 0x8e7   :  { %v789_v61 = vpop.xlane.xlu0 %788 }
 0x8e8   :  { %v792_v63 = vmul.f32 0.0078125, %v789_v61  ;;  %v2649_v61 = vld [vmem:[%s3592_s7 + $0x90] ss:$8 sps:$4 sm:$0xff]  }
 0x8e9   :  { %v791_v3 = vpop.xlane.xlu1 %790 }
 0x8ea   :  { %v794_v4 = vadd.f32 1e-05, %v792_v63  ;;  %v793_v5 = vmul.f32 0.0078125, %v791_v3 }
 0x8ec   :  { %2748 = vrsqrt.f32 %v794_v4  ;;  %v795_v7 = vadd.f32 1e-05, %v793_v5 }
 0x8ee   :  { %2750 = vrsqrt.f32 %v795_v7 }
 0x8f6   :  { %v2749_v9 = vpop.eup %2748 }
 0x8f7   :  { %v798_v10 = vmul.f32 %v2749_v9, %v3188_v41 }
 0x8f8   :  { %v2751_v11 = vpop.eup %2750 }
 0x8f9   :  { %v799_v15 = vmul.f32 %v2751_v11, %v3191_v45  ;;  %v806_v16 = vmul.f32 %v2168_v13, %v798_v10  ;;  %v2654_v11 = vld [vmem:[%s3591_s5 + $0xa4] ss:$8 sps:$4 sm:$0xff]  }
 0x8fb   :  { %v807_v17 = vmul.f32 %v2168_v13, %v799_v15  ;;  %v2652_v13 = vld [vmem:[%s3591_s5 + $0xa0] ss:$8 sps:$4 sm:$0xff]  }
 0x8fc   :  { %v2655_v15 = vld [vmem:[%s3592_s7 + $0xa0] ss:$8 sps:$4 sm:$0xff]  }
 0x8fd   :  { %v824_v18 = vpack.c.bf16 %v807_v17, %v806_v16  ;;  %v2660_v16 = vld [vmem:[%s3591_s5 + $0xb4] ss:$8 sps:$4 sm:$0xff]  }
 0x8fe   :  { %v2663_v17 = vld [vmem:[%s3592_s7 + $0xb4] ss:$8 sps:$4 sm:$0xff]  }
 0x8ff   :  { %938 = vmatmul.mubr.bf16.vlgmr.msra.gmra.mrb[20].mxu1 %v824_v18  ;;  %v2658_v18 = vld [vmem:[%s3591_s5 + $0xb0] ss:$8 sps:$4 sm:$0xff]  }
 0x900   :  { %1242 = vmatprep.mubr.bf16.mxu1 %v2796_v34  ;;  %1211 = vmatpush1.bf16.msra.mxu1 %v2640_v52 }
 0x901   :  { %1212 = vmatprep.subr.bf16.mxu1 %v2648_v58 }
 0x904   :  { %1213 = vmatpush1.bf16.msra.mxu1 %v2646_v60  ;;  %v2215_v60 = vld [vmem:[%s3595_s6 + $0x2] sm:$0x3] }
 0x905   :  { %1214 = vmatprep.subr.bf16.mxu1 %v2654_v11 }
 0x908   :  { %1215 = vmatpush1.bf16.msra.mxu1 %v2652_v13 }
 0x909   :  { %1216 = vmatprep.subr.bf16.mxu1 %v2660_v16 }
 0x90c   :  { %1217 = vmatpush1.bf16.msra.mxu1 %v2658_v18 }
 0x90d   :  { %1218 = vmatprep.subr.bf16.mxu1 %v2666_v23 }
 0x910   :  { %1219 = vmatpush1.bf16.msra.mxu1 %v2664_v21 }
 0x911   :  { %1220 = vmatprep.subr.bf16.mxu1 %v2672_v28 }
 0x914   :  { %1221 = vmatpush1.bf16.msra.mxu1 %v2670_v31 }
 0x9d2   :  { %v939_v32 = vpop.f32.mrb[20].mxu1 }
 0x9d3   :  { %v2185_v33 = vmul.f32 -1.442695, %v939_v32  ;;  %v941_v27 = vpop.f32.mrb[21].mxu1 }
 0x9d4   :  { %v943_v36 = vpop.f32.mrb[22].mxu1 }
 0x9d5   :  { %2752 = vpow2.f32 %v2185_v33  ;;  %v2186_v37 = vmul.f32 -1.442695, %v943_v36  ;;  %v945_v25 = vpop.f32.mrb[23].mxu1  ;;  %v2678_v33 = vld [vmem:[%s3591_s5 + $0xe4] ss:$8 sps:$4 sm:$0xff]  }
 0x9d6   :  { %1222 = vmatprep.subr.bf16.mxu1 %v2678_v33 }
 0x9d7   :  { %2754 = vpow2.f32 %v2186_v37  ;;  %v2679_v37 = vld [vmem:[%s3592_s7 + $0xe0] ss:$8 sps:$4 sm:$0xff]  }
 0x9df   :  { %v2753_v38 = vpop.eup %2752 }
 0x9e0   :  { %v954_v39 = vadd.f32 1.0, %v2753_v38  ;;  %v2687_v38 = vld [vmem:[%s3592_s7 + $0xf4] ss:$8 sps:$4 sm:$0xff]  }
 0x9e1   :  { %v2755_v40 = vpop.eup %2754 }
 0x9e2   :  { %2756 = vrcp.f32 %v954_v39  ;;  %v955_v43 = vadd.f32 1.0, %v2755_v40  ;;  %v2682_v39 = vld [vmem:[%s3591_s5 + $0xf0] ss:$8 sps:$4 sm:$0xff]  }
 0x9e3   :  { %v2685_v40 = vld [vmem:[%s3592_s7 + $0xf0] ss:$8 sps:$4 sm:$0xff]  }
 0x9e4   :  { %2758 = vrcp.f32 %v955_v43 }
 0x9ec   :  { %v2757_v44 = vpop.eup %2756 }
 0x9ed   :  { %v960_v47 = vmul.f32 %v2757_v44, %v939_v32  ;;  %v2673_v32 = vld [vmem:[%s3592_s7 + $0xd0] ss:$8 sps:$4 sm:$0xff]  }
 0x9ee   :  { %v2759_v48 = vpop.eup %2758 }
 0x9ef   :  { %v962_v49 = vmul.f32 %v960_v47, %v941_v27  ;;  %v961_v50 = vmul.f32 %v2759_v48, %v943_v36  ;;  %v2681_v27 = vld [vmem:[%s3592_s7 + $0xe4] ss:$8 sps:$4 sm:$0xff]   ;;  %v2676_v36 = vld [vmem:[%s3591_s5 + $0xe0] ss:$8 sps:$4 sm:$0xff]  }
 0x9f0   :  { %1223 = vmatpush1.bf16.msra.mxu1 %v2676_v36 }
 0x9f1   :  { %v963_v0 = vmul.f32 %v961_v50, %v945_v25  ;;  %v2684_v25 = vld [vmem:[%s3591_s5 + $0xf4] ss:$8 sps:$4 sm:$0xff]  }
 0x9f2   :  { %1224 = vmatprep.subr.bf16.mxu1 %v2684_v25 }
 0x9f3   :  { %v980_v1 = vpack.c.bf16 %v963_v0, %v962_v49 }
 0x9f4   :  { %1225 = vmatpush1.bf16.msra.mxu1 %v2682_v39 }
 0x9f5   :  { %2471 = vmatmul.mubr.bf16.vlgmr.msra.gmra.mrb[8].mxu0 %v980_v1  ;;  %2474 = vmatprep.subr.bf16.mxu1 %v2797_v51 }
 0x9f6   :  { %1395 = vmatprep.mubr.bf16.mxu0 %v2796_v34  ;;  %1364 = vmatpush1.bf16.msra.mxu0 %v2643_v55 }
 0x9f7   :  { %1365 = vmatprep.subr.bf16.mxu0 %v2651_v59 }
 0x9fa   :  { %1366 = vmatpush1.bf16.msra.mxu0 %v2649_v61  ;;  %v2248_v61 = vld [vmem:[%s3596_s8 + $0x2] sm:$0x3] }
 0xac8   :  { %v1063_v63 = vpop.f32.mrb[8].mxu0 }
 0xac9   :  { %v3290_v3 = vadd.f32 %v1063_v63, %v3188_v41  ;;  %v2472_v4 = vpop.f32.mrb[9].mxu0  ;;  %v1123_v63 = vrot.slane %v2215_v60, %v3002_v54 }
 0xaca   :  { %v1066_v5 = vpop.f32.mrb[10].mxu0  ;;  %v1276_v4 = vrot.slane %v2248_v61, %v3002_v54 }
 0xacb   :  { %2195 = vst [vmem:[%s3593_s14 + $0x10] sm:$0xff] %v3290_v3  ;;  %v3297_v7 = vadd.f32 %v1066_v5, %v3191_v45  ;;  %v2473_v9 = vpop.f32.mrb[11].mxu0  ;;  %v1077_v10 = vmul.f32 %v3290_v3, %v3290_v3  ;;  %v2657_v45 = vld [vmem:[%s3592_s7 + $0xa4] ss:$8 sps:$4 sm:$0xff]   ;;  %v1127_v5 = vrot.slane %v2215_v60, %v3010_v57 }
 0xacc   :  { %1367 = vmatprep.subr.bf16.mxu0 %v2657_v45  ;;  %v1280_v9 = vrot.slane %v2248_v61, %v3010_v57 }
 0xacd   :  { %2196 = vst [vmem:[%s3593_s14 + $0x18] sm:$0xff] %v3297_v7  ;;  %1079 = vadd.xlane.f32.xlu0 %v1077_v10  ;;  %v1078_v41 = vmul.f32 %v3297_v7, %v3297_v7  ;;  %1368 = vmatpush1.bf16.msra.mxu0 %v2655_v15 }
 0xace   :  { %1369 = vmatprep.subr.bf16.mxu0 %v2663_v17 }
 0xad1   :  { %1081 = vadd.xlane.f32.xlu0 %v1078_v41  ;;  %1370 = vmatpush1.bf16.msra.mxu0 %v2661_v19 }
 0xad2   :  { %1371 = vmatprep.subr.bf16.mxu0 %v2669_v26 }
 0xad5   :  { %1372 = vmatpush1.bf16.msra.mxu0 %v2667_v24 }
 0xad6   :  { %1373 = vmatprep.subr.bf16.mxu0 %v2675_v29 }
 0xad9   :  { %1374 = vmatpush1.bf16.msra.mxu0 %v2673_v32 }
 0xada   :  { %1375 = vmatprep.subr.bf16.mxu0 %v2681_v27 }
 0xadd   :  { %1376 = vmatpush1.bf16.msra.mxu0 %v2679_v37 }
 0xade   :  { %1377 = vmatprep.subr.bf16.mxu0 %v2687_v38 }
 0xae1   :  { %1378 = vmatpush1.bf16.msra.mxu0 %v2685_v40 }
 0xae2   :  { %2498 = vmatprep.subr.bf16.mxu0 %v2797_v51 }
 0xb5a   :  { %v1080_v43 = vpop.xlane.xlu0 %1079 }
 0xb5b   :  { %v1083_v44 = vmul.f32 0.0078125, %v1080_v43 }
 0xb5d   :  { %v1085_v47 = vadd.f32 1e-05, %v1083_v44 }
 0xb5e   :  { %v1082_v48 = vpop.xlane.xlu0 %1081 }
 0xb5f   :  { %2760 = vrsqrt.f32 %v1085_v47  ;;  %v1084_v49 = vmul.f32 0.0078125, %v1082_v48 }
 0xb61   :  { %v1086_v50 = vadd.f32 1e-05, %v1084_v49 }
 0xb63   :  { %2762 = vrsqrt.f32 %v1086_v50 }
 0xb69   :  { %v2761_v0 = vpop.eup %2760 }
 0xb6a   :  { %v1089_v1 = vmul.f32 %v2761_v0, %v3290_v3 }
 0xb6c   :  { %v1097_v56 = vmul.f32 %v2198_v53, %v1089_v1 }
 0xb6d   :  { %v2763_v52 = vpop.eup %2762 }
 0xb6e   :  { %v1090_v55 = vmul.f32 %v2763_v52, %v3297_v7 }
 0xb70   :  { %v1098_v58 = vmul.f32 %v2198_v53, %v1090_v55 }
 0xb72   :  { %v1116_v59 = vpack.c.bf16 %v1098_v58, %v1097_v56 }
 0xb74   :  { %1243 = vmatmul.mubr.bf16.vlgmr.msra.gmra.mrb[24].mxu1 %v1116_v59  ;;  %1396 = vmatmul.mubr.bf16.vlgmr.msra.gmra.mrb[12].mxu0 %v1116_v59 }
 0xb75   :  { %2476 = vmatprep.mubr.msk.bf16.mxu1 %vm2798_vm0, %v2797_v51  ;;  %2514 = vmatprep.mubr.msk.bf16.mxu0 %vm2798_vm0, %v2797_v51 }
 0xc47   :  { %v1244_v10 = vpop.f32.mrb[24].mxu1  ;;  %v1397_v41 = vpop.f32.mrb[12].mxu0 }
 0xc48   :  { %v1245_v11 = vadd.f32 %v1244_v10, %v1123_v63  ;;  %v1398_v45 = vadd.f32 %v1397_v41, %v1276_v4  ;;  %v1246_v13 = vpop.f32.mrb[25].mxu1  ;;  %v1399_v15 = vpop.f32.mrb[13].mxu0 }
 0xc49   :  { %v1247_v16 = vadd.f32 %v1246_v13, %v1127_v5  ;;  %v1400_v17 = vadd.f32 %v1399_v15, %v1280_v9  ;;  %v1248_v18 = vpop.f32.mrb[26].mxu1  ;;  %v1401_v19 = vpop.f32.mrb[14].mxu0 }
 0xc4a   :  { %v1406_v21 = vmul.f32 %v1245_v11, %v3023_v62  ;;  %v1410_v23 = vmul.f32 %v1398_v45, %v3028_v2  ;;  %v1249_v24 = vadd.f32 %v1248_v18, %v1123_v63  ;;  %v1402_v54 = vadd.f32 %v1401_v19, %v1276_v4  ;;  %v1250_v26 = vpop.f32.mrb[27].mxu1  ;;  %v1403_v28 = vpop.f32.mrb[15].mxu0 }
 0xc4b   :  { %v1407_v57 = vmul.f32 %v1247_v16, %v3033_v6  ;;  %v1411_v29 = vmul.f32 %v1400_v17, %v3038_v8  ;;  %v1251_v31 = vadd.f32 %v1250_v26, %v1127_v5  ;;  %v1404_v32 = vadd.f32 %v1403_v28, %v1280_v9 }
 0xc4c   :  { %v1408_v33 = vmul.f32 %v1249_v24, %v3043_v12  ;;  %v1412_v27 = vmul.f32 %v1402_v54, %v3048_v14  ;;  %v1414_v36 = vadd.f32 %v1410_v23, %v1406_v21 }
 0xc4d   :  { %v1415_v37 = vadd.f32 %v1411_v29, %v1407_v57  ;;  %v1409_v62 = vmul.f32 %v1251_v31, %v3055_v20  ;;  %v1413_v2 = vmul.f32 %v1404_v32, %v3060_v22 }
 0xc4e   :  { %1420 = vrot.lane.b32.xlu0 %v1414_v36, %s2799_s2  ;;  %v1416_v25 = vadd.f32 %v1412_v27, %v1408_v33 }
 0xc4f   :  { %v1418_v38 = vpack.c.bf16 %v1415_v37, %v1415_v37  ;;  %v1417_v39 = vadd.f32 %v1413_v2, %v1409_v62 }
 0xc51   :  { %v1428_v6 = vsel %vm405_vm1, %v1418_v38, 0  ;;  %v1555_v10 = vpack.c.bf16 %v1417_v39, %v1417_v39 }
 0xc52   :  { %2475 = vmatpush3.bf16.xpose.msra.mxu1 %v1428_v6  ;;  %1557 = vrot.lane.b32.xlu0 %v1416_v25, %s2799_s2 }
 0xc53   :  { %2480 = vmatprep.subr.bf16.mxu1 %v2797_v51  ;;  %v1565_v13 = vsel %vm405_vm1, %v1555_v10, 0 }
 0xcc0   :  { %v1421_v8 = vpop.permute.xlu0 %1420 }
 0xcc1   :  { %v1423_v12 = vpack.c.bf16 %v1421_v8, %v1414_v36 }
 0xcc3   :  { %2477 = vmatmul.mubr.msk.bf16.vlgmr.msra.gmra.mrb[28].mxu1 %vm405_vm1, %v1423_v12 }
 0xcc4   :  { %2482 = vmatprep.mubr.msk.bf16.mxu1 %vm2798_vm0, %v2797_v51  ;;  %v1558_v15 = vpop.permute.xlu0 %1557 }
 0xcc5   :  { %v1560_v16 = vpack.c.bf16 %v1558_v15, %v1416_v25 }
 0xd96   :  { %v1464_v14 = vpop.f32.mrb[28].mxu1 }
 0xd97   :  { %v1471_v20 = vmul.f32 0.125, %v1464_v14  ;;  %v2478_v22 = vpop.f32.mrb[29].mxu1 }
 0xd98   :  { %v1467_v40 = vpop.f32.mrb[30].mxu1 }
 0xd99   :  { %v1472_v43 = vmul.f32 0.125, %v1467_v40  ;;  %v2479_v44 = vpop.f32.mrb[31].mxu1  ;;  %v1475_v47 = vadd.f32 %v1471_v20, %v3079_v42 }
 0xd9b   :  { %v1477_v48 = vsel %vm459_vm2, %v1475_v47, -inf  ;;  %v1476_v49 = vadd.f32 %v1472_v43, %v3084_v46 }
 0xd9c   :  { %1478 = vmax.xlane.f32.xlu1 %v1477_v48  ;;  %v2689_v48 = vld [vmem:[%s3600_s9 + $0x48] sm:$0xff]  }
 0xd9d   :  { %v1480_v50 = vsel %vm459_vm2, %v1476_v49, -inf }
 0xda0   :  { %1481 = vmax.xlane.f32.xlu1 %v1480_v50  ;;  %v2692_v50 = vld [vmem:[%s3600_s9 + $0x60] sm:$0xff]  }
 0xe29   :  { %v1479_v0 = vpop.xlane.xlu1 %1478 }
 0xe2a   :  { %v1483_v1 = vsub.f32 %v1475_v47, %v1479_v0  ;;  %v2688_v47 = vld [vmem:[%s3600_s9 + $0x40] sm:$0xff]   ;;  %v2693_v0 = vld [vmem:[%s3600_s9 + $0x68] sm:$0xff]  }
 0xe2b   :  { %2499 = vmatpush3.bf16.msra.mxu0 %v2688_v47  ;;  %v2726_v47 = vld [vmem:[%s3603_s12 + $0x70] sm:$0xff]  }
 0xe2c   :  { %v1485_v52 = vmul.f32 1.442695, %v1483_v1  ;;  %2500 = vmatprep.subr.bf16.mxu0 %v2797_v51  ;;  %v2694_v1 = vld [vmem:[%s3600_s9 + $0x70] sm:$0xff]  }
 0xe2d   :  { %v1482_v53 = vpop.xlane.xlu1 %1481 }
 0xe2e   :  { %2764 = vpow2.f32 %v1485_v52  ;;  %v1484_v55 = vsub.f32 %v1476_v49, %v1482_v53  ;;  %v2690_v49 = vld [vmem:[%s3600_s9 + $0x50] sm:$0xff]   ;;  %v2695_v52 = vld [vmem:[%s3600_s9 + $0x78] sm:$0xff]  }
 0xe2f   :  { %2501 = vmatpush3.bf16.msra.mxu0 %v2689_v48  ;;  %v2727_v48 = vld [vmem:[%s3603_s12 + $0x78] sm:$0xff]  }
 0xe30   :  { %v1487_v56 = vmul.f32 1.442695, %v1484_v55  ;;  %2502 = vmatprep.subr.bf16.mxu0 %v2797_v51 }
 0xe32   :  { %2766 = vpow2.f32 %v1487_v56 }
 0xe33   :  { %2503 = vmatpush3.bf16.msra.mxu0 %v2690_v49 }
 0xe34   :  { %2504 = vmatprep.subr.bf16.mxu0 %v2797_v51 }
 0xe38   :  { %v2765_v58 = vpop.eup %2764 }
 0xe39   :  { %v1489_v59 = vsel %vm459_vm2, %v2765_v58, 0.0 }
 0xe3a   :  { %1490 = vadd.xlane.f32.xlu1 %v1489_v59 }
 0xe3c   :  { %v2767_v42 = vpop.eup %2766 }
 0xe3d   :  { %v1492_v60 = vsel %vm459_vm2, %v2767_v42, 0.0 }
 0xe3e   :  { %1493 = vadd.xlane.f32.xlu1 %v1492_v60 }
 0xe4f   :  { %1501 = vrot.lane.b32.xlu1 %v1418_v38, %s2799_s2 }
 0xec7   :  { %v1491_v46 = vpop.xlane.xlu1 %1490 }
 0xec8   :  { %2768 = vrcp.f32 %v1491_v46 }
 0xecb   :  { %v1494_v61 = vpop.xlane.xlu1 %1493 }
 0xecc   :  { %2770 = vrcp.f32 %v1494_v61 }
 0xecf   :  { %v1502_v63 = vpop.permute.xlu1 %1501 }
 0xed0   :  { %v1507_v4 = vsel %vm489_vm3, %v1502_v63, 0 }
 0xed1   :  { %2481 = vmatpush3.bf16.msra.mxu1 %v1507_v4 }
 0xed2   :  { %2486 = vmatprep.subr.bf16.mxu1 %v2797_v51  ;;  %v2769_v5 = vpop.eup %2768 }
 0xed3   :  { %v1497_v41 = vmul.f32 %v2769_v5, %v2765_v58  ;;  %v2696_v5 = vld [vmem:[%s3601_s11 + $0x80] ss:$8 sps:$4 sm:$0xff]  }
 0xed6   :  { %v2771_v9 = vpop.eup %2770 }
 0xed7   :  { %v1498_v11 = vmul.f32 %v2771_v9, %v2767_v42  ;;  %v2698_v9 = vld [vmem:[%s3601_s11 + $0x84] ss:$8 sps:$4 sm:$0xff]  }
 0xed9   :  { %v1499_v45 = vpack.c.bf16 %v1498_v11, %v1497_v41  ;;  %v2699_v41 = vld [vmem:[%s3601_s11 + $0x90] ss:$8 sps:$4 sm:$0xff]   ;;  %v2704_v11 = vld [vmem:[%s3601_s11 + $0xa4] ss:$8 sps:$4 sm:$0xff]  }
 0xedb   :  { %2483 = vmatmul.mubr.msk.bf16.vlgmr.msra.gmra.mrb[32].mxu1 %vm459_vm2, %v1499_v45  ;;  %v2702_v45 = vld [vmem:[%s3601_s11 + $0xa0] ss:$8 sps:$4 sm:$0xff]  }
 0xedc   :  { %2487 = vmatpush3.bf16.xpose.msra.mxu1 %v1565_v13  ;;  %2488 = vmatprep.mubr.msk.bf16.mxu1 %vm2798_vm0, %v2797_v51 }
 0xedd   :  { %2492 = vmatprep.subr.bf16.mxu1 %v2797_v51 }
 0xee3   :  { %2489 = vmatmul.mubr.msk.bf16.vlgmr.msra.gmra.mrb[36].mxu1 %vm405_vm1, %v1560_v16 }
 0xee4   :  { %2494 = vmatprep.mubr.msk.bf16.mxu1 %vm2798_vm0, %v2797_v51 }
 0xfae   :  { %v3432_v17 = vpop.f32.mrb[32].mxu1 }
 0xfaf   :  { %v2484_v18 = vpop.f32.mrb[33].mxu1 }
 0xfb0   :  { %v3434_v19 = vpop.f32.mrb[34].mxu1 }
 0xfb1   :  { %v2485_v21 = vpop.f32.mrb[35].mxu1 }
 0xfb6   :  { %v1601_v23 = vpop.f32.mrb[36].mxu1 }
 0xfb7   :  { %v1608_v24 = vmul.f32 0.125, %v1601_v23  ;;  %v2490_v54 = vpop.f32.mrb[37].mxu1 }
 0xfb8   :  { %v1604_v26 = vpop.f32.mrb[38].mxu1  ;;  %v2710_v54 = vld [vmem:[%s3601_s11 + $0xc4] ss:$8 sps:$4 sm:$0xff]  }
 0xfb9   :  { %v1609_v28 = vmul.f32 0.125, %v1604_v26  ;;  %v2491_v57 = vpop.f32.mrb[39].mxu1  ;;  %v1612_v29 = vadd.f32 %v3113_v30, %v1608_v24  ;;  %v2707_v24 = vld [vmem:[%s3601_s11 + $0xb4] ss:$8 sps:$4 sm:$0xff]  }
 0xfba   :  { %v2713_v26 = vld [vmem:[%s3601_s11 + $0xd4] ss:$8 sps:$4 sm:$0xff]   ;;  %v2716_v57 = vld [vmem:[%s3601_s11 + $0xe4] ss:$8 sps:$4 sm:$0xff]  }
 0xfbb   :  { %v1614_v31 = vsel %vm459_vm2, %v1612_v29, -inf  ;;  %v1613_v32 = vadd.f32 %v3118_v35, %v1609_v28  ;;  %v2711_v28 = vld [vmem:[%s3601_s11 + $0xd0] ss:$8 sps:$4 sm:$0xff]  }
 0xfbc   :  { %1615 = vmax.xlane.f32.xlu0 %v1614_v31  ;;  %v2719_v31 = vld [vmem:[%s3601_s11 + $0xf4] ss:$8 sps:$4 sm:$0xff]  }
 0xfbd   :  { %v1617_v33 = vsel %vm459_vm2, %v1613_v32, -inf }
 0xfbe   :  { %1618 = vmax.xlane.f32.xlu1 %v1617_v33 }
0x1049   :  { %v1616_v27 = vpop.xlane.xlu0 %1615 }
0x104a   :  { %v1620_v36 = vsub.f32 %v1612_v29, %v1616_v27  ;;  %v2714_v29 = vld [vmem:[%s3601_s11 + $0xe0] ss:$8 sps:$4 sm:$0xff]  }
0x104b   :  { %v1619_v37 = vpop.xlane.xlu1 %1618 }
0x104c   :  { %v1622_v62 = vmul.f32 1.442695, %v1620_v36  ;;  %v1621_v2 = vsub.f32 %v1613_v32, %v1619_v37  ;;  %v2717_v32 = vld [vmem:[%s3601_s11 + $0xf0] ss:$8 sps:$4 sm:$0xff]  }
0x104e   :  { %2772 = vpow2.f32 %v1622_v62  ;;  %v1624_v25 = vmul.f32 1.442695, %v1621_v2 }
0x1050   :  { %2774 = vpow2.f32 %v1624_v25 }
0x1058   :  { %v2773_v38 = vpop.eup %2772 }
0x1059   :  { %v1626_v39 = vsel %vm459_vm2, %v2773_v38, 0.0 }
0x105a   :  { %v2775_v30 = vpop.eup %2774  ;;  %1627 = vadd.xlane.f32.xlu0 %v1626_v39 }
0x105b   :  { %v1629_v6 = vsel %vm459_vm2, %v2775_v30, 0.0 }
0x105e   :  { %1630 = vadd.xlane.f32.xlu0 %v1629_v6 }
0x1074   :  { %1638 = vrot.lane.b32.xlu0 %v1555_v10, %s2799_s2  ;;  %v2701_v10 = vld [vmem:[%s3601_s11 + $0x94] ss:$8 sps:$4 sm:$0xff]  }
0x10e7   :  { %v1628_v35 = vpop.xlane.xlu0 %1627 }
0x10e8   :  { %2776 = vrcp.f32 %v1628_v35 }
0x10eb   :  { %v1631_v8 = vpop.xlane.xlu0 %1630 }
0x10ec   :  { %2778 = vrcp.f32 %v1631_v8 }
0x10ef   :  { %v1639_v12 = vpop.permute.xlu0 %1638 }
0x10f0   :  { %v1644_v14 = vsel %vm489_vm3, %v1639_v12, 0 }
0x10f1   :  { %2493 = vmatpush3.bf16.msra.mxu1 %v1644_v14  ;;  %v2720_v14 = vld [vmem:[%s3603_s12 + $0x40] sm:$0xff]  }
0x10f2   :  { %v2777_v20 = vpop.eup %2776  ;;  %1923 = vmatprep.subr.bf16.mxu1 %v2698_v9 }
0x10f3   :  { %v1634_v40 = vmul.f32 %v2777_v20, %v2773_v38  ;;  %v2721_v20 = vld [vmem:[%s3603_s12 + $0x48] sm:$0xff]  }
0x10f6   :  { %v2779_v22 = vpop.eup %2778 }
0x10f7   :  { %v1635_v43 = vmul.f32 %v2779_v22, %v2775_v30  ;;  %v2296_v30 = vld [vmem:[%s3602_s10 + $0x1] ss:$0 sm:$0xff]  ;;  %v2722_v22 = vld [vmem:[%s3603_s12 + $0x50] sm:$0xff]  }
0x10f9   :  { %v1636_v44 = vpack.c.bf16 %v1635_v43, %v1634_v40  ;;  %v2723_v40 = vld [vmem:[%s3603_s12 + $0x58] sm:$0xff]   ;;  %v2724_v43 = vld [vmem:[%s3603_s12 + $0x60] sm:$0xff]  }
0x10fb   :  { %2495 = vmatmul.mubr.msk.bf16.vlgmr.msra.gmra.mrb[40].mxu1 %vm459_vm2, %v1636_v44  ;;  %v2725_v44 = vld [vmem:[%s3603_s12 + $0x68] sm:$0xff]  }
0x10fc   :  { %1955 = vmatprep.mubr.bf16.mxu1 %v2796_v34  ;;  %v2691_v34 = vld [vmem:[%s3600_s9 + $0x58] sm:$0xff]   ;;  %1924 = vmatpush1.bf16.msra.mxu1 %v2696_v5 }
0x10fd   :  { %2505 = vmatpush3.bf16.msra.mxu0 %v2691_v34  ;;  %1925 = vmatprep.subr.bf16.mxu1 %v2701_v10 }
0x10fe   :  { %2506 = vmatprep.subr.bf16.mxu0 %v2797_v51 }
0x1100   :  { %1926 = vmatpush1.bf16.msra.mxu1 %v2699_v41 }
0x1101   :  { %2507 = vmatpush3.bf16.msra.mxu0 %v2692_v50  ;;  %1927 = vmatprep.subr.bf16.mxu1 %v2704_v11 }
0x1102   :  { %2508 = vmatprep.subr.bf16.mxu0 %v2797_v51 }
0x1104   :  { %1928 = vmatpush1.bf16.msra.mxu1 %v2702_v45 }
0x1105   :  { %2509 = vmatpush3.bf16.msra.mxu0 %v2693_v0  ;;  %1929 = vmatprep.subr.bf16.mxu1 %v2707_v24 }
0x1106   :  { %2510 = vmatprep.subr.bf16.mxu0 %v2797_v51 }
0x1109   :  { %2511 = vmatpush3.bf16.msra.mxu0 %v2694_v1 }
0x110a   :  { %2512 = vmatprep.subr.bf16.mxu0 %v2797_v51 }
0x110d   :  { %2513 = vmatpush3.bf16.msra.mxu0 %v2695_v52 }
0x110e   :  { %2518 = vmatprep.subr.bf16.mxu0 %v2797_v51 }
0x11ce   :  { %v1680_v53 = vpop.f32.mrb[40].mxu1 }
0x11cf   :  { %v2496_v55 = vpop.f32.mrb[41].mxu1 }
0x11d0   :  { %v1683_v56 = vpop.f32.mrb[42].mxu1 }
0x11d1   :  { %v2547_v58 = vpack.i.bf16 %v1683_v56, %v3434_v19  ;;  %v2497_v59 = vpop.f32.mrb[43].mxu1 }
0x11d3   :  { %2548 = vrot.lane.b32.xlu1 %v2547_v58, %s2799_s2 }
0x1245   :  { %v2549_v42 = vpop.permute.xlu1 %2548 }
0x1246   :  { %v2551_v60 = vunpack.i.h.bf16 %v2549_v42  ;;  %v2550_v46 = vunpack.i.l.bf16 %v2549_v42 }
0x1248   :  { %v1691_v61 = vsel %vm405_vm1, %v1680_v53, %v2551_v60  ;;  %v1554_v63 = vsel %vm405_vm1, %v3432_v17, %v2550_v46 }
0x1249   :  { %v1709_v4 = vpack.c.bf16 %v1691_v61, %v1554_v63 }
0x124b   :  { %2515 = vmatmul.mubr.bf16.vlgmr.msra.gmra.mrb[16].mxu0 %v1709_v4 }
0x124c   :  { %2534 = vmatprep.mubr.msk.bf16.mxu0 %vm2798_vm0, %v2797_v51  ;;  %2519 = vmatpush3.bf16.msra.mxu0 %v2720_v14 }
0x124d   :  { %2520 = vmatprep.subr.bf16.mxu0 %v2797_v51 }
0x1250   :  { %2521 = vmatpush3.bf16.msra.mxu0 %v2721_v20 }
0x1251   :  { %2522 = vmatprep.subr.bf16.mxu0 %v2797_v51 }
0x1254   :  { %2523 = vmatpush3.bf16.msra.mxu0 %v2722_v22 }
0x1255   :  { %2524 = vmatprep.subr.bf16.mxu0 %v2797_v51 }
0x1258   :  { %2525 = vmatpush3.bf16.msra.mxu0 %v2723_v40 }
0x1259   :  { %2526 = vmatprep.subr.bf16.mxu0 %v2797_v51 }
0x125c   :  { %2527 = vmatpush3.bf16.msra.mxu0 %v2724_v43 }
0x125d   :  { %2528 = vmatprep.subr.bf16.mxu0 %v2797_v51 }
0x1260   :  { %2529 = vmatpush3.bf16.msra.mxu0 %v2725_v44 }
0x1261   :  { %2530 = vmatprep.subr.bf16.mxu0 %v2797_v51 }
0x1264   :  { %2531 = vmatpush3.bf16.msra.mxu0 %v2726_v47 }
0x1265   :  { %2532 = vmatprep.subr.bf16.mxu0 %v2797_v51 }
0x1268   :  { %2533 = vmatpush3.bf16.msra.mxu0 %v2727_v48 }
0x131e   :  { %v1792_v13 = vpop.f32.mrb[16].mxu0 }
0x131f   :  { %v3504_v15 = vadd.f32 %v1792_v13, %v3290_v3  ;;  %v2516_v16 = vpop.f32.mrb[17].mxu0  ;;  %v2705_v3 = vld [vmem:[%s3601_s11 + $0xb0] ss:$8 sps:$4 sm:$0xff]  }
0x1320   :  { %v1795_v17 = vpop.f32.mrb[18].mxu0  ;;  %1930 = vmatpush1.bf16.msra.mxu1 %v2705_v3 }
0x1321   :  { %v3507_v18 = vadd.f32 %v1795_v17, %v3297_v7  ;;  %v2517_v19 = vpop.f32.mrb[19].mxu0  ;;  %v1803_v21 = vmul.f32 %v3504_v15, %v3504_v15  ;;  %v2708_v7 = vld [vmem:[%s3601_s11 + $0xc0] ss:$8 sps:$4 sm:$0xff]   ;;  %1931 = vmatprep.subr.bf16.mxu1 %v2710_v54 }
0x1323   :  { %1805 = vadd.xlane.f32.xlu0 %v1803_v21  ;;  %v1804_v23 = vmul.f32 %v3507_v18, %v3507_v18 }
0x1324   :  { %1932 = vmatpush1.bf16.msra.mxu1 %v2708_v7 }
0x1325   :  { %1807 = vadd.xlane.f32.xlu1 %v1804_v23  ;;  %1933 = vmatprep.subr.bf16.mxu1 %v2713_v26 }
0x1328   :  { %1934 = vmatpush1.bf16.msra.mxu1 %v2711_v28 }
0x1329   :  { %1935 = vmatprep.subr.bf16.mxu1 %v2716_v57 }
0x132c   :  { %1936 = vmatpush1.bf16.msra.mxu1 %v2714_v29 }
0x132d   :  { %1937 = vmatprep.subr.bf16.mxu1 %v2719_v31 }
0x1330   :  { %1938 = vmatpush1.bf16.msra.mxu1 %v2717_v32 }
0x13b0   :  { %v1806_v33 = vpop.xlane.xlu0 %1805 }
0x13b1   :  { %v1809_v27 = vmul.f32 0.0078125, %v1806_v33 }
0x13b2   :  { %v1808_v36 = vpop.xlane.xlu1 %1807 }
0x13b3   :  { %v1811_v37 = vadd.f32 1e-05, %v1809_v27  ;;  %v1810_v62 = vmul.f32 0.0078125, %v1808_v36 }
0x13b5   :  { %2780 = vrsqrt.f32 %v1811_v37  ;;  %v1812_v2 = vadd.f32 1e-05, %v1810_v62 }
0x13b7   :  { %2782 = vrsqrt.f32 %v1812_v2 }
0x13bf   :  { %v2781_v25 = vpop.eup %2780 }
0x13c0   :  { %v1815_v38 = vmul.f32 %v2781_v25, %v3504_v15 }
0x13c1   :  { %v2783_v39 = vpop.eup %2782 }
0x13c2   :  { %v1816_v6 = vmul.f32 %v2783_v39, %v3507_v18  ;;  %v1823_v35 = vmul.f32 %v2296_v30, %v1815_v38 }
0x13c4   :  { %v1824_v8 = vmul.f32 %v2296_v30, %v1816_v6 }
0x13c6   :  { %v1842_v12 = vpack.c.bf16 %v1824_v8, %v1823_v35 }
0x13c8   :  { %1956 = vmatmul.mubr.bf16.vlgmr.msra.gmra.mrb[44].mxu1 %v1842_v12 }
0x149b   :  { %v1957_v49 = vpop.f32.mrb[44].mxu1 }
0x149c   :  { %v2329_v34 = vmul.f32 -1.442695, %v1957_v49  ;;  %v1959_v50 = vpop.f32.mrb[45].mxu1 }
0x149d   :  { %v1961_v0 = vpop.f32.mrb[46].mxu1 }
0x149e   :  { %2784 = vpow2.f32 %v2329_v34  ;;  %v2330_v1 = vmul.f32 -1.442695, %v1961_v0  ;;  %v1963_v52 = vpop.f32.mrb[47].mxu1 }
0x14a0   :  { %2786 = vpow2.f32 %v2330_v1 }
0x14a8   :  { %v2785_v53 = vpop.eup %2784 }
0x14a9   :  { %v1972_v55 = vadd.f32 1.0, %v2785_v53 }
0x14aa   :  { %v2787_v56 = vpop.eup %2786 }
0x14ab   :  { %2788 = vrcp.f32 %v1972_v55  ;;  %v1973_v58 = vadd.f32 1.0, %v2787_v56 }
0x14ad   :  { %2790 = vrcp.f32 %v1973_v58 }
0x14b5   :  { %v2789_v51 = vpop.eup %2788 }
0x14b6   :  { %v1978_v59 = vmul.f32 %v2789_v51, %v1957_v49 }
0x14b7   :  { %v2791_v42 = vpop.eup %2790 }
0x14b8   :  { %v1980_v60 = vmul.f32 %v1978_v59, %v1959_v50  ;;  %v1979_v46 = vmul.f32 %v2791_v42, %v1961_v0 }
0x14ba   :  { %v1981_v61 = vmul.f32 %v1979_v46, %v1963_v52 }
0x14bc   :  { %v1999_v63 = vpack.c.bf16 %v1981_v61, %v1980_v60 }
0x14be   :  { %2535 = vmatmul.mubr.bf16.vlgmr.msra.gmra.mrb[20].mxu0 %v1999_v63 }
0x1591   :  { %v2082_v4 = vpop.f32.mrb[20].mxu0 }
0x1592   :  { %v2089_v5 = vadd.f32 %v2082_v4, %v3504_v15  ;;  %v2536_v9 = vpop.f32.mrb[21].mxu0  ;;  %v2355_v15 = vld [vmem:[%s3604_s13] ss:$0 sm:$0xff] }
0x1593   :  { %v2085_v10 = vpop.f32.mrb[22].mxu0 }
0x1594   :  { %v2090_v41 = vadd.f32 %v2085_v10, %v3507_v18  ;;  %v2537_v11 = vpop.f32.mrb[23].mxu0  ;;  %v2092_v45 = vmul.f32 %v2089_v5, %v2089_v5 }
0x1596   :  { %2094 = vadd.xlane.f32.xlu0 %v2092_v45  ;;  %v2093_v13 = vmul.f32 %v2090_v41, %v2090_v41 }
0x159a   :  { %2096 = vadd.xlane.f32.xlu0 %v2093_v13 }
0x1623   :  { %v2095_v16 = vpop.xlane.xlu0 %2094 }
0x1624   :  { %v2098_v17 = vmul.f32 0.0078125, %v2095_v16 }
0x1626   :  { %v2100_v19 = vadd.f32 1e-05, %v2098_v17 }
0x1627   :  { %v2097_v21 = vpop.xlane.xlu0 %2096 }
0x1628   :  { %2792 = vrsqrt.f32 %v2100_v19  ;;  %v2099_v23 = vmul.f32 0.0078125, %v2097_v21 }
0x162a   :  { %v2101_v24 = vadd.f32 1e-05, %v2099_v23 }
0x162c   :  { %2794 = vrsqrt.f32 %v2101_v24 }
0x1632   :  { %v2793_v3 = vpop.eup %2792 }
0x1633   :  { %v2104_v7 = vmul.f32 %v2793_v3, %v2089_v5 }
0x1635   :  { %v2112_v18 = vmul.f32 %v2355_v15, %v2104_v7 }
0x1636   :  { %v2795_v54 = vpop.eup %2794 }
0x1637   :  { %2356 = vst [vmem:[%s3593_s14 + $0x20] sm:$0xff] %v2112_v18  ;;  %v2105_v26 = vmul.f32 %v2795_v54, %v2090_v41 }
0x1639   :  { %v2113_v28 = vmul.f32 %v2355_v15, %v2105_v26 }
0x163b   :  { %2357 = vst [vmem:[%s3593_s14 + $0x28] sm:$0xff] %v2113_v28 }

</bundles_post_ra>
